<compile_context>
chip_gen: v7x
topology: tpu7x:2x2x1
jax: 0.10.0
libtpu: 0.0.40
codegen_flags: <defaults>
</compile_context>

<pallas_src>
import functools

import jax
import jax.numpy as jnp
from jax import lax
from jax.experimental import pallas as pl
from jax.experimental.pallas import tpu as pltpu

_LANE = 128
_SUBLANE = 8


def _round_up(n, m):
    return ((n + m - 1) // m) * m


def _lstm_linear_kernel(x_ref, wih_ref, whh_ref, b_ref, wlin_ref, blin_ref,
                        out_ref, gx_ref, seq_ref,
                        *, num_layers, seq_len, p, bp):
    """Stacked LSTM + fused Linear for one batch shard.

    Shapes (P = padded feature/hidden width, Bp = padded batch shard,
    Op = padded output width):
      x_ref    : (S, Bp, P)    f32   layer-0 input (zero padded)
      wih_ref  : (L, P, 4P)    bf16  input->gates (transposed, gate-block padded)
      whh_ref  : (L, P, 4P)    bf16  hidden->gates (transposed, gate-block padded)
      b_ref    : (L, 1, 4P)    f32   b_ih + b_hh (gate-block padded)
      wlin_ref : (P, Op)       bf16  final linear weight (transposed, padded)
      blin_ref : (1, Op)       f32   final linear bias (padded)
      out_ref  : (S, Bp, Op)   f32   linear(lstm_out)
    Scratch:
      gx_ref   : (S, Bp, 4P)   f32   hoisted x@W_ih + bias for current layer
      seq_ref  : (S, Bp, P)    f32   current layer's output sequence
    """
    P, Bp, S = p, bp, seq_len

    for layer in range(num_layers):
        # ---- Hoisted input projection (one big MXU matmul per layer). ----
        if layer == 0:
            inp = x_ref[...].reshape(S * Bp, P)
        else:
            inp = seq_ref[...].reshape(S * Bp, P)
        gx = jnp.dot(inp.astype(jnp.bfloat16), wih_ref[layer],
                     preferred_element_type=jnp.float32) + b_ref[layer]
        gx_ref[...] = gx.reshape(S, Bp, 4 * P)

        # ---- Serial recurrence: only h @ W_hh remains in the loop. ----
        def step(t, carry, _layer=layer):
            h, c = carry                                         # f32 (Bp, P)
            gates = gx_ref[t] + jnp.dot(
                h.astype(jnp.bfloat16), whh_ref[_layer],
                preferred_element_type=jnp.float32)              # (Bp, 4P)
            # Each gate occupies its own 128-lane-aligned block.
            i_g = jax.nn.sigmoid(gates[:, 0 * P:1 * P])
            f_g = jax.nn.sigmoid(gates[:, 1 * P:2 * P])
            g_g = jnp.tanh(gates[:, 2 * P:3 * P])
            o_g = jax.nn.sigmoid(gates[:, 3 * P:4 * P])
            c_new = f_g * c + i_g * g_g
            h_new = o_g * jnp.tanh(c_new)
            seq_ref[t] = h_new
            return h_new, c_new

        h0 = jnp.zeros((Bp, P), jnp.float32)
        c0 = jnp.zeros((Bp, P), jnp.float32)
        lax.fori_loop(0, S, step, (h0, c0))

    # ---- Final Linear: one lane-dense matmul over the whole sequence. ----
    flat = seq_ref[...].reshape(S * Bp, P).astype(jnp.bfloat16)
    lin = jnp.dot(flat, wlin_ref[...],
                  preferred_element_type=jnp.float32) + blin_ref[...]
    out_ref[...] = lin.reshape(S, Bp, -1)


def init_params(key, input_size, hidden_size, num_layers, output_size):
    """Deterministic parameter init mirroring nn.LSTM / nn.Linear shapes."""
    params = {"lstm": [], "linear": {}}
    k = 1.0 / jnp.sqrt(hidden_size)
    keys = jax.random.split(key, num_layers * 4 + 2)
    ki = 0
    for layer in range(num_layers):
        in_dim = input_size if layer == 0 else hidden_size
        w_ih = jax.random.uniform(keys[ki], (4 * hidden_size, in_dim),
                                  jnp.float32, -k, k); ki += 1
        w_hh = jax.random.uniform(keys[ki], (4 * hidden_size, hidden_size),
                                  jnp.float32, -k, k); ki += 1
        b_ih = jax.random.uniform(keys[ki], (4 * hidden_size,),
                                  jnp.float32, -k, k); ki += 1
        b_hh = jax.random.uniform(keys[ki], (4 * hidden_size,),
                                  jnp.float32, -k, k); ki += 1
        params["lstm"].append(dict(w_ih=w_ih, w_hh=w_hh, b_ih=b_ih, b_hh=b_hh))
    kl = 1.0 / jnp.sqrt(hidden_size)
    params["linear"]["w"] = jax.random.uniform(
        keys[ki], (output_size, hidden_size), jnp.float32, -kl, kl); ki += 1
    params["linear"]["b"] = jax.random.uniform(
        keys[ki], (output_size,), jnp.float32, -kl, kl)
    return params


def general_ltsm_forward(x, params, hidden_size, num_layers, output_size):
    """Pallas-backed forward.  Returns (x, linear_out): `x` matches the PyTorch
    module's return value; `linear_out` is the kernel-computed LSTM+Linear."""
    S, B, I = x.shape
    H, L, O = hidden_size, num_layers, output_size

    # Padded widths: every layer input / hidden / gate block is P lanes wide,
    # output is Op lanes wide, batch is padded to sublane multiples of 8.
    P = max(_round_up(I, _LANE), _round_up(H, _LANE))
    Op = _round_up(O, _LANE)
    Bp = _SUBLANE
    nb = -(-B // Bp)                      # number of batch shards (grid size)
    Bt = nb * Bp

    # ---- Stage input (zero padded batch + feature). ----
    x_pad = jnp.zeros((S, Bt, P), jnp.float32)
    x_pad = x_pad.at[:, :B, :I].set(x.astype(jnp.float32))

    # ---- Stage weights: gate k of layer l lives in columns [k*P, k*P+H). ----
    wih = jnp.zeros((L, P, 4 * P), jnp.float32)
    whh = jnp.zeros((L, P, 4 * P), jnp.float32)
    b = jnp.zeros((L, 1, 4 * P), jnp.float32)
    for l, pm in enumerate(params["lstm"]):
        w_ih_t = pm["w_ih"].T.astype(jnp.float32)   # (in_dim, 4H)
        w_hh_t = pm["w_hh"].T.astype(jnp.float32)   # (H, 4H)
        bias = (pm["b_ih"] + pm["b_hh"]).astype(jnp.float32)
        in_dim = w_ih_t.shape[0]
        for g in range(4):
            wih = wih.at[l, :in_dim, g * P:g * P + H].set(
                w_ih_t[:, g * H:(g + 1) * H])
            whh = whh.at[l, :H, g * P:g * P + H].set(
                w_hh_t[:, g * H:(g + 1) * H])
            b = b.at[l, 0, g * P:g * P + H].set(bias[g * H:(g + 1) * H])
    wih = wih.astype(jnp.bfloat16)
    whh = whh.astype(jnp.bfloat16)

    wlin = jnp.zeros((P, Op), jnp.float32)
    wlin = wlin.at[:H, :O].set(params["linear"]["w"].T.astype(jnp.float32))
    wlin = wlin.astype(jnp.bfloat16)
    blin = jnp.zeros((1, Op), jnp.float32)
    blin = blin.at[0, :O].set(params["linear"]["b"].astype(jnp.float32))

    kernel = functools.partial(_lstm_linear_kernel,
                               num_layers=L, seq_len=S, p=P, bp=Bp)

    out_pad = pl.pallas_call(
        kernel,
        out_shape=jax.ShapeDtypeStruct((S, Bt, Op), jnp.float32),
        grid_spec=pltpu.PrefetchScalarGridSpec(
            num_scalar_prefetch=0,
            grid=(nb,),
            in_specs=[
                pl.BlockSpec((S, Bp, P), lambda i: (0, i, 0)),        # x
                pl.BlockSpec((L, P, 4 * P), lambda i: (0, 0, 0)),     # wih
                pl.BlockSpec((L, P, 4 * P), lambda i: (0, 0, 0)),     # whh
                pl.BlockSpec((L, 1, 4 * P), lambda i: (0, 0, 0)),     # bias
                pl.BlockSpec((P, Op), lambda i: (0, 0)),              # wlin
                pl.BlockSpec((1, Op), lambda i: (0, 0)),              # blin
            ],
            out_specs=pl.BlockSpec((S, Bp, Op), lambda i: (0, i, 0)),
            scratch_shapes=[
                pltpu.VMEM((S, Bp, 4 * P), jnp.float32),   # hoisted x@W_ih + b
                pltpu.VMEM((S, Bp, P), jnp.float32),       # layer output seq
            ],
        ),
        compiler_params=pltpu.CompilerParams(
            dimension_semantics=("parallel",)),
    )(x_pad, wih, whh, b, wlin, blin)

    out = out_pad[:, :B, :O]
    # PyTorch forward() returns x (its input); the linear output is exposed
    # alongside so the Pallas-computed hot path can be verified.
    return x, out


def _reference_forward(x, params, hidden_size, num_layers, output_size):
    """Pure-JAX f32 reference (matches PyTorch nn.LSTM + nn.Linear)."""
    S, B, _ = x.shape
    H = hidden_size
    seq = x.astype(jnp.float32)
    for l in range(num_layers):
        p = params["lstm"][l]
        w_ih, w_hh = p["w_ih"].T, p["w_hh"].T
        bias = p["b_ih"] + p["b_hh"]
        h = jnp.zeros((B, H), jnp.float32)
        c = jnp.zeros((B, H), jnp.float32)
        outs = []
        for t in range(S):
            g = seq[t] @ w_ih + h @ w_hh + bias
            i = jax.nn.sigmoid(g[:, 0 * H:1 * H])
            f = jax.nn.sigmoid(g[:, 1 * H:2 * H])
            gg = jnp.tanh(g[:, 2 * H:3 * H])
            o = jax.nn.sigmoid(g[:, 3 * H:4 * H])
            c = f * c + i * gg
            h = o * jnp.tanh(c)
            outs.append(h)
        seq = jnp.stack(outs, axis=0)
    flat = seq.reshape(S * B, H)
    lin = flat @ params["linear"]["w"].T + params["linear"]["b"]
    return lin.reshape(S, B, output_size)


if __name__ == "__main__":
    # Small shapes consistent with the module's forward (seq, batch, feature).
    SEQ, BATCH, INPUT_SIZE = 8, 2, 4
    HIDDEN, NUM_LAYERS, OUTPUT_SIZE = 32, 2, 1

    key = jax.random.PRNGKey(0)
    kx, kp = jax.random.split(key)
    x = jax.random.normal(kx, (SEQ, BATCH, INPUT_SIZE), jnp.float32)
    params = init_params(kp, INPUT_SIZE, HIDDEN, NUM_LAYERS, OUTPUT_SIZE)

    x_ret, out = general_ltsm_forward(x, params, HIDDEN, NUM_LAYERS,
                                      OUTPUT_SIZE)
    jax.block_until_ready((x_ret, out))

    # Module semantics: forward returns its input unchanged.
    assert x_ret.shape == x.shape
    assert bool(jnp.allclose(x_ret, x))

    # Verify the Pallas LSTM+Linear path against a pure-JAX f32 reference.
    # (Kernel matmuls use bf16 weights/activations -> relaxed tolerance.)
    ref = _reference_forward(x, params, HIDDEN, NUM_LAYERS, OUTPUT_SIZE)
    assert out.shape == (SEQ, BATCH, OUTPUT_SIZE)
    assert bool(jnp.allclose(out, ref, atol=2e-2, rtol=2e-2))

    print("KERNEL_OK")
</pallas_src>

<mosaic_0001>
module attributes {stable_mosaic.version = 11 : i64} {
  func.func @_lstm_linear_kernel(%arg0: i32, %arg1: memref<8x8x128xf32, #tpu.memory_space<vmem>>, %arg2: memref<2x128x512xbf16, #tpu.memory_space<vmem>>, %arg3: memref<2x128x512xbf16, #tpu.memory_space<vmem>>, %arg4: memref<2x1x512xf32, #tpu.memory_space<vmem>>, %arg5: memref<128x128xbf16, #tpu.memory_space<vmem>>, %arg6: memref<1x128xf32, #tpu.memory_space<vmem>>, %arg7: memref<8x8x128xf32, #tpu.memory_space<vmem>>, %arg8: memref<8x8x512xf32, #tpu.memory_space<vmem>>, %arg9: memref<8x8x128xf32, #tpu.memory_space<vmem>>) attributes {dimension_semantics = [#tpu.dimension_semantics<parallel>], iteration_bounds = array<i64: 1>, scalar_prefetch = 0 : i64, scratch_operands = 2 : i64, tpu.core_type = #tpu.core_type<tc>, window_params = [{transform_indices = @transform_0, window_bounds = array<i64: 8, 8, 128>}, {pipeline_mode = #tpu.pipeline_mode<synchronous>, transform_indices = @transform_1, window_bounds = array<i64: 2, 128, 512>}, {pipeline_mode = #tpu.pipeline_mode<synchronous>, transform_indices = @transform_2, window_bounds = array<i64: 2, 128, 512>}, {pipeline_mode = #tpu.pipeline_mode<synchronous>, transform_indices = @transform_3, window_bounds = array<i64: 2, 1, 512>}, {pipeline_mode = #tpu.pipeline_mode<synchronous>, transform_indices = @transform_4, window_bounds = array<i64: 128, 128>}, {pipeline_mode = #tpu.pipeline_mode<synchronous>, transform_indices = @transform_5, window_bounds = array<i64: 1, 128>}, {transform_indices = @transform_6, window_bounds = array<i64: 8, 8, 128>}]} {
    %c0 = arith.constant 0 : index
    %c0_0 = arith.constant 0 : index
    %c0_1 = arith.constant 0 : index
    %0 = vector.load %arg1[%c0, %c0_0, %c0_1] : memref<8x8x128xf32, #tpu.memory_space<vmem>>, vector<8x8x128xf32>
    %1 = vector.shape_cast %0 : vector<8x8x128xf32> to vector<64x128xf32>
    %2 = arith.truncf %1 : vector<64x128xf32> to vector<64x128xbf16>
    %c0_2 = arith.constant 0 : index
    %c0_3 = arith.constant 0 : index
    %c0_4 = arith.constant 0 : index
    %3 = vector.load %arg2[%c0_2, %c0_3, %c0_4] : memref<2x128x512xbf16, #tpu.memory_space<vmem>>, vector<1x128x512xbf16>
    %4 = vector.shape_cast %3 : vector<1x128x512xbf16> to vector<128x512xbf16>
    %cst = arith.constant dense<0.000000e+00> : vector<64x512xf32>
    %5 = tpu.matmul %2, %4, %cst {dimension_numbers = #tpu.dot_dimension_numbers<[1], [0], [0], [1], [0, 0, 1, 1], [], []>} : vector<64x128xbf16>, vector<128x512xbf16>, vector<64x512xf32> -> vector<64x512xf32>
    %c0_5 = arith.constant 0 : index
    %c0_6 = arith.constant 0 : index
    %c0_7 = arith.constant 0 : index
    %6 = vector.load %arg4[%c0_5, %c0_6, %c0_7] : memref<2x1x512xf32, #tpu.memory_space<vmem>>, vector<1x1x512xf32>
    %7 = vector.shape_cast %6 : vector<1x1x512xf32> to vector<1x512xf32>
    %8 = vector.broadcast %7 : vector<1x512xf32> to vector<64x512xf32>
    %9 = arith.addf %5, %8 : vector<64x512xf32>
    %10 = vector.shape_cast %9 : vector<64x512xf32> to vector<8x8x512xf32>
    %c0_8 = arith.constant 0 : index
    %c0_9 = arith.constant 0 : index
    %c0_10 = arith.constant 0 : index
    %11 = vector.load %arg8[%c0_8, %c0_9, %c0_10] : memref<8x8x512xf32, #tpu.memory_space<vmem>>, vector<8x8x512xf32>
    tpu.vector_store %arg8[%c0_8, %c0_9, %c0_10], %10 {strides = array<i32>} : memref<8x8x512xf32, #tpu.memory_space<vmem>>, vector<8x8x512xf32>,
    %cst_11 = arith.constant 0.000000e+00 : f32
    %12 = vector.broadcast %cst_11 : f32 to vector<8x128xf32>
    %cst_12 = arith.constant 0.000000e+00 : f32
    %13 = vector.broadcast %cst_12 : f32 to vector<8x128xf32>
    %c0_i32 = arith.constant 0 : i32
    %c8_i32 = arith.constant 8 : i32
    %14 = arith.addi %c0_i32, %c8_i32 : i32
    %c1_i32 = arith.constant 1 : i32
    %15:2 = scf.for %arg10 = %c0_i32 to %14 step %c1_i32 iter_args(%arg11 = %12, %arg12 = %13) -> (vector<8x128xf32>, vector<8x128xf32>)  : i32 {
      %42 = arith.index_cast %arg10 : i32 to index
      %c0_43 = arith.constant 0 : index
      %c0_44 = arith.constant 0 : index
      %43 = vector.load %arg8[%42, %c0_43, %c0_44] : memref<8x8x512xf32, #tpu.memory_space<vmem>>, vector<1x8x512xf32>
      %44 = vector.shape_cast %43 : vector<1x8x512xf32> to vector<8x512xf32>
      %45 = arith.truncf %arg11 : vector<8x128xf32> to vector<8x128xbf16>
      %c0_45 = arith.constant 0 : index
      %c0_46 = arith.constant 0 : index
      %c0_47 = arith.constant 0 : index
      %46 = vector.load %arg3[%c0_45, %c0_46, %c0_47] : memref<2x128x512xbf16, #tpu.memory_space<vmem>>, vector<1x128x512xbf16>
      %47 = vector.shape_cast %46 : vector<1x128x512xbf16> to vector<128x512xbf16>
      %cst_48 = arith.constant dense<0.000000e+00> : vector<8x512xf32>
      %48 = tpu.matmul %45, %47, %cst_48 {dimension_numbers = #tpu.dot_dimension_numbers<[1], [0], [0], [1], [0, 0, 1, 1], [], []>} : vector<8x128xbf16>, vector<128x512xbf16>, vector<8x512xf32> -> vector<8x512xf32>
      %49 = arith.addf %44, %48 : vector<8x512xf32>
      %50 = vector.extract_strided_slice %49 {offsets = [0, 0], sizes = [8, 128], strides = [1, 1]} : vector<8x512xf32> to vector<8x128xf32>
      %51 = arith.negf %50 : vector<8x128xf32>
      %52 = math.exp %51 : vector<8x128xf32>
      %cst_49 = arith.constant 1.000000e+00 : f32
      %53 = vector.broadcast %cst_49 : f32 to vector<8x128xf32>
      %54 = arith.addf %53, %52 : vector<8x128xf32>
      %55 = arith.divf %53, %54 : vector<8x128xf32>
      %56 = vector.extract_strided_slice %49 {offsets = [0, 128], sizes = [8, 128], strides = [1, 1]} : vector<8x512xf32> to vector<8x128xf32>
      %57 = arith.negf %56 : vector<8x128xf32>
      %58 = math.exp %57 : vector<8x128xf32>
      %cst_50 = arith.constant 1.000000e+00 : f32
      %59 = vector.broadcast %cst_50 : f32 to vector<8x128xf32>
      %60 = arith.addf %59, %58 : vector<8x128xf32>
      %61 = arith.divf %59, %60 : vector<8x128xf32>
      %62 = vector.extract_strided_slice %49 {offsets = [0, 256], sizes = [8, 128], strides = [1, 1]} : vector<8x512xf32> to vector<8x128xf32>
      %63 = math.tanh %62 : vector<8x128xf32>
      %64 = vector.extract_strided_slice %49 {offsets = [0, 384], sizes = [8, 128], strides = [1, 1]} : vector<8x512xf32> to vector<8x128xf32>
      %65 = arith.negf %64 : vector<8x128xf32>
      %66 = math.exp %65 : vector<8x128xf32>
      %cst_51 = arith.constant 1.000000e+00 : f32
      %67 = vector.broadcast %cst_51 : f32 to vector<8x128xf32>
      %68 = arith.addf %67, %66 : vector<8x128xf32>
      %69 = arith.divf %67, %68 : vector<8x128xf32>
      %70 = arith.mulf %61, %arg12 : vector<8x128xf32>
      %71 = arith.mulf %55, %63 : vector<8x128xf32>
      %72 = arith.addf %70, %71 : vector<8x128xf32>
      %73 = math.tanh %72 : vector<8x128xf32>
      %74 = arith.mulf %69, %73 : vector<8x128xf32>
      %75 = arith.index_cast %arg10 : i32 to index
      %c0_52 = arith.constant 0 : index
      %c0_53 = arith.constant 0 : index
      %76 = vector.load %arg9[%75, %c0_52, %c0_53] : memref<8x8x128xf32, #tpu.memory_space<vmem>>, vector<1x8x128xf32>
      %77 = vector.shape_cast %76 : vector<1x8x128xf32> to vector<8x128xf32>
      %78 = vector.shape_cast %74 : vector<8x128xf32> to vector<1x8x128xf32>
      tpu.vector_store %arg9[%75, %c0_52, %c0_53], %78 {strides = array<i32>} : memref<8x8x128xf32, #tpu.memory_space<vmem>>, vector<1x8x128xf32>,
      scf.yield %74, %72 : vector<8x128xf32>, vector<8x128xf32>
    }
    %c8_i32_13 = arith.constant 8 : i32
    %c0_14 = arith.constant 0 : index
    %c0_15 = arith.constant 0 : index
    %c0_16 = arith.constant 0 : index
    %16 = vector.load %arg9[%c0_14, %c0_15, %c0_16] : memref<8x8x128xf32, #tpu.memory_space<vmem>>, vector<8x8x128xf32>
    %17 = vector.shape_cast %16 : vector<8x8x128xf32> to vector<64x128xf32>
    %18 = arith.truncf %17 : vector<64x128xf32> to vector<64x128xbf16>
    %c1 = arith.constant 1 : index
    %c0_17 = arith.constant 0 : index
    %c0_18 = arith.constant 0 : index
    %19 = vector.load %arg2[%c1, %c0_17, %c0_18] : memref<2x128x512xbf16, #tpu.memory_space<vmem>>, vector<1x128x512xbf16>
    %20 = vector.shape_cast %19 : vector<1x128x512xbf16> to vector<128x512xbf16>
    %cst_19 = arith.constant dense<0.000000e+00> : vector<64x512xf32>
    %21 = tpu.matmul %18, %20, %cst_19 {dimension_numbers = #tpu.dot_dimension_numbers<[1], [0], [0], [1], [0, 0, 1, 1], [], []>} : vector<64x128xbf16>, vector<128x512xbf16>, vector<64x512xf32> -> vector<64x512xf32>
    %c1_20 = arith.constant 1 : index
    %c0_21 = arith.constant 0 : index
    %c0_22 = arith.constant 0 : index
    %22 = vector.load %arg4[%c1_20, %c0_21, %c0_22] : memref<2x1x512xf32, #tpu.memory_space<vmem>>, vector<1x1x512xf32>
    %23 = vector.shape_cast %22 : vector<1x1x512xf32> to vector<1x512xf32>
    %24 = vector.broadcast %23 : vector<1x512xf32> to vector<64x512xf32>
    %25 = arith.addf %21, %24 : vector<64x512xf32>
    %26 = vector.shape_cast %25 : vector<64x512xf32> to vector<8x8x512xf32>
    %c0_23 = arith.constant 0 : index
    %c0_24 = arith.constant 0 : index
    %c0_25 = arith.constant 0 : index
    %27 = vector.load %arg8[%c0_23, %c0_24, %c0_25] : memref<8x8x512xf32, #tpu.memory_space<vmem>>, vector<8x8x512xf32>
    tpu.vector_store %arg8[%c0_23, %c0_24, %c0_25], %26 {strides = array<i32>} : memref<8x8x512xf32, #tpu.memory_space<vmem>>, vector<8x8x512xf32>,
    %cst_26 = arith.constant 0.000000e+00 : f32
    %28 = vector.broadcast %cst_26 : f32 to vector<8x128xf32>
    %cst_27 = arith.constant 0.000000e+00 : f32
    %29 = vector.broadcast %cst_27 : f32 to vector<8x128xf32>
    %c0_i32_28 = arith.constant 0 : i32
    %c8_i32_29 = arith.constant 8 : i32
    %30 = arith.addi %c0_i32_28, %c8_i32_29 : i32
    %c1_i32_30 = arith.constant 1 : i32
    %31:2 = scf.for %arg10 = %c0_i32_28 to %30 step %c1_i32_30 iter_args(%arg11 = %28, %arg12 = %29) -> (vector<8x128xf32>, vector<8x128xf32>)  : i32 {
      %42 = arith.index_cast %arg10 : i32 to index
      %c0_43 = arith.constant 0 : index
      %c0_44 = arith.constant 0 : index
      %43 = vector.load %arg8[%42, %c0_43, %c0_44] : memref<8x8x512xf32, #tpu.memory_space<vmem>>, vector<1x8x512xf32>
      %44 = vector.shape_cast %43 : vector<1x8x512xf32> to vector<8x512xf32>
      %45 = arith.truncf %arg11 : vector<8x128xf32> to vector<8x128xbf16>
      %c1_45 = arith.constant 1 : index
      %c0_46 = arith.constant 0 : index
      %c0_47 = arith.constant 0 : index
      %46 = vector.load %arg3[%c1_45, %c0_46, %c0_47] : memref<2x128x512xbf16, #tpu.memory_space<vmem>>, vector<1x128x512xbf16>
      %47 = vector.shape_cast %46 : vector<1x128x512xbf16> to vector<128x512xbf16>
      %cst_48 = arith.constant dense<0.000000e+00> : vector<8x512xf32>
      %48 = tpu.matmul %45, %47, %cst_48 {dimension_numbers = #tpu.dot_dimension_numbers<[1], [0], [0], [1], [0, 0, 1, 1], [], []>} : vector<8x128xbf16>, vector<128x512xbf16>, vector<8x512xf32> -> vector<8x512xf32>
      %49 = arith.addf %44, %48 : vector<8x512xf32>
      %50 = vector.extract_strided_slice %49 {offsets = [0, 0], sizes = [8, 128], strides = [1, 1]} : vector<8x512xf32> to vector<8x128xf32>
      %51 = arith.negf %50 : vector<8x128xf32>
      %52 = math.exp %51 : vector<8x128xf32>
      %cst_49 = arith.constant 1.000000e+00 : f32
      %53 = vector.broadcast %cst_49 : f32 to vector<8x128xf32>
      %54 = arith.addf %53, %52 : vector<8x128xf32>
      %55 = arith.divf %53, %54 : vector<8x128xf32>
      %56 = vector.extract_strided_slice %49 {offsets = [0, 128], sizes = [8, 128], strides = [1, 1]} : vector<8x512xf32> to vector<8x128xf32>
      %57 = arith.negf %56 : vector<8x128xf32>
      %58 = math.exp %57 : vector<8x128xf32>
      %cst_50 = arith.constant 1.000000e+00 : f32
      %59 = vector.broadcast %cst_50 : f32 to vector<8x128xf32>
      %60 = arith.addf %59, %58 : vector<8x128xf32>
      %61 = arith.divf %59, %60 : vector<8x128xf32>
      %62 = vector.extract_strided_slice %49 {offsets = [0, 256], sizes = [8, 128], strides = [1, 1]} : vector<8x512xf32> to vector<8x128xf32>
      %63 = math.tanh %62 : vector<8x128xf32>
      %64 = vector.extract_strided_slice %49 {offsets = [0, 384], sizes = [8, 128], strides = [1, 1]} : vector<8x512xf32> to vector<8x128xf32>
      %65 = arith.negf %64 : vector<8x128xf32>
      %66 = math.exp %65 : vector<8x128xf32>
      %cst_51 = arith.constant 1.000000e+00 : f32
      %67 = vector.broadcast %cst_51 : f32 to vector<8x128xf32>
      %68 = arith.addf %67, %66 : vector<8x128xf32>
      %69 = arith.divf %67, %68 : vector<8x128xf32>
      %70 = arith.mulf %61, %arg12 : vector<8x128xf32>
      %71 = arith.mulf %55, %63 : vector<8x128xf32>
      %72 = arith.addf %70, %71 : vector<8x128xf32>
      %73 = math.tanh %72 : vector<8x128xf32>
      %74 = arith.mulf %69, %73 : vector<8x128xf32>
      %75 = arith.index_cast %arg10 : i32 to index
      %c0_52 = arith.constant 0 : index
      %c0_53 = arith.constant 0 : index
      %76 = vector.load %arg9[%75, %c0_52, %c0_53] : memref<8x8x128xf32, #tpu.memory_space<vmem>>, vector<1x8x128xf32>
      %77 = vector.shape_cast %76 : vector<1x8x128xf32> to vector<8x128xf32>
      %78 = vector.shape_cast %74 : vector<8x128xf32> to vector<1x8x128xf32>
      tpu.vector_store %arg9[%75, %c0_52, %c0_53], %78 {strides = array<i32>} : memref<8x8x128xf32, #tpu.memory_space<vmem>>, vector<1x8x128xf32>,
      scf.yield %74, %72 : vector<8x128xf32>, vector<8x128xf32>
    }
    %c8_i32_31 = arith.constant 8 : i32
    %c0_32 = arith.constant 0 : index
    %c0_33 = arith.constant 0 : index
    %c0_34 = arith.constant 0 : index
    %32 = vector.load %arg9[%c0_32, %c0_33, %c0_34] : memref<8x8x128xf32, #tpu.memory_space<vmem>>, vector<8x8x128xf32>
    %33 = vector.shape_cast %32 : vector<8x8x128xf32> to vector<64x128xf32>
    %34 = arith.truncf %33 : vector<64x128xf32> to vector<64x128xbf16>
    %c0_35 = arith.constant 0 : index
    %c0_36 = arith.constant 0 : index
    %35 = vector.load %arg5[%c0_35, %c0_36] : memref<128x128xbf16, #tpu.memory_space<vmem>>, vector<128x128xbf16>
    %cst_37 = arith.constant dense<0.000000e+00> : vector<64x128xf32>
    %36 = tpu.matmul %34, %35, %cst_37 {dimension_numbers = #tpu.dot_dimension_numbers<[1], [0], [0], [1], [0, 0, 1, 1], [], []>} : vector<64x128xbf16>, vector<128x128xbf16>, vector<64x128xf32> -> vector<64x128xf32>
    %c0_38 = arith.constant 0 : index
    %c0_39 = arith.constant 0 : index
    %37 = vector.load %arg6[%c0_38, %c0_39] : memref<1x128xf32, #tpu.memory_space<vmem>>, vector<1x128xf32>
    %38 = vector.broadcast %37 : vector<1x128xf32> to vector<64x128xf32>
    %39 = arith.addf %36, %38 : vector<64x128xf32>
    %40 = vector.shape_cast %39 : vector<64x128xf32> to vector<8x8x128xf32>
    %c0_40 = arith.constant 0 : index
    %c0_41 = arith.constant 0 : index
    %c0_42 = arith.constant 0 : index
    %41 = vector.load %arg7[%c0_40, %c0_41, %c0_42] : memref<8x8x128xf32, #tpu.memory_space<vmem>>, vector<8x8x128xf32>
    tpu.vector_store %arg7[%c0_40, %c0_41, %c0_42], %40 {strides = array<i32>} : memref<8x8x128xf32, #tpu.memory_space<vmem>>, vector<8x8x128xf32>,
    return
  }
  func.func @transform_0(%arg0: i32) -> (i32, i32, i32) {
    %c0_i32 = arith.constant 0 : i32
    %c0_i32_0 = arith.constant 0 : i32
    %c0_i32_1 = arith.constant 0 : i32
    return %c0_i32, %arg0, %c0_i32_0 : i32, i32, i32
  }
  func.func @transform_1(%arg0: i32) -> (i32, i32, i32) {
    %c0_i32 = arith.constant 0 : i32
    %c0_i32_0 = arith.constant 0 : i32
    %c0_i32_1 = arith.constant 0 : i32
    %c0_i32_2 = arith.constant 0 : i32
    return %c0_i32, %c0_i32_0, %c0_i32_1 : i32, i32, i32
  }
  func.func @transform_2(%arg0: i32) -> (i32, i32, i32) {
    %c0_i32 = arith.constant 0 : i32
    %c0_i32_0 = arith.constant 0 : i32
    %c0_i32_1 = arith.constant 0 : i32
    %c0_i32_2 = arith.constant 0 : i32
    return %c0_i32, %c0_i32_0, %c0_i32_1 : i32, i32, i32
  }
  func.func @transform_3(%arg0: i32) -> (i32, i32, i32) {
    %c0_i32 = arith.constant 0 : i32
    %c0_i32_0 = arith.constant 0 : i32
    %c0_i32_1 = arith.constant 0 : i32
    %c0_i32_2 = arith.constant 0 : i32
    return %c0_i32, %c0_i32_0, %c0_i32_1 : i32, i32, i32
  }
  func.func @transform_4(%arg0: i32) -> (i32, i32) {
    %c0_i32 = arith.constant 0 : i32
    %c0_i32_0 = arith.constant 0 : i32
    %c0_i32_1 = arith.constant 0 : i32
    return %c0_i32, %c0_i32_0 : i32, i32
  }
  func.func @transform_5(%arg0: i32) -> (i32, i32) {
    %c0_i32 = arith.constant 0 : i32
    %c0_i32_0 = arith.constant 0 : i32
    %c0_i32_1 = arith.constant 0 : i32
    return %c0_i32, %c0_i32_0 : i32, i32
  }
  func.func @transform_6(%arg0: i32) -> (i32, i32, i32) {
    %c0_i32 = arith.constant 0 : i32
    %c0_i32_0 = arith.constant 0 : i32
    %c0_i32_1 = arith.constant 0 : i32
    return %c0_i32, %arg0, %c0_i32_0 : i32, i32, i32
  }
}

</mosaic_0001>

<bundles_post_ra>
// kernel: tpu_custom_call.1
= control target key start
LH: loop header
LB: loop body
LE: loop exit
PB: predicated region body
PF: predicated region fallthrough
CT: control target
= control target key end

     0   :  { %11 = vsyncpa [#allocation5], 0  ;;  %s2711_s0 = inlined_call_operand.hbm [shape: f32[8,8,128], index: 0, kind: input, shape index: {}]   ;;  %s2712_s1 = inlined_call_operand.hbm [shape: bf16[2,128,512], index: 1, kind: input, shape index: {}]   ;;  %s2713_s2 = inlined_call_operand.hbm [shape: bf16[2,128,512], index: 2, kind: input, shape index: {}]   ;;  %s2714_s3 = inlined_call_operand.vmem [shape: f32[2,1,512], index: 3, kind: input, shape index: {}]   ;;  %s2715_s4 = inlined_call_operand.hbm [shape: bf16[128,128], index: 4, kind: input, shape index: {}]   ;;  %s2716_s5 = inlined_call_operand.vmem [shape: f32[1,128], index: 5, kind: input, shape index: {}]   ;;  %s2717_s6 = inlined_call_operand.hbm [shape: f32[8,8,128], index: 6, kind: output, shape index: {}]  }
   0x1   :  { %12 = vsyncpa [#allocation8], 0 }
   0x2   :  { %13 = vsyncpa [#allocation11], 0 }
   0x3   :  { %14 = vsyncpa [#allocation6], 0  ;;  %s2402_s21 = smov [#allocation7]   ;;  %s2236_s25 = scalar_lea.hbm %s2712_s1, 8192 }
   0x4   :  { %s32_s22 = sshll.u32 %s2402_s21, 4  ;;  %p2237_p0 = scmp.ne.s32.totalorder %s2712_s1, %s2236_s25  ;;  %s33_s22 = int_to_ptr.vmem [resolvable:$true] %s32_s22 }
   0x5   :  { %p2240_p1 = scmp.lt.u32.totalorder %s2236_s25, %s2712_s1 }
   0x7   :  { %p2242_p2 = pnand %p2240_p1, %p2237_p0 }
   0x9   :  { %2245 = shalt.err (!%p2242_p2)
}
   0xa   :  { %s2246_s30 = scalar_lea.vmem %s33_s22, 8192  ;;  %p2251_p4 = scmp.lt.s32.totalorder %s33_s22, %s33_s22 }
   0xb   :  { %p2247_p3 = scmp.ne.s32.totalorder %s33_s22, %s2246_s30  ;;  %p2252_p5 = scmp.lt.s32.totalorder %s2246_s30, %s2246_s30 }
   0xd   :  { %p2253_p6 = por %p2252_p5, %p2251_p4 }
   0xf   :  { %p2254_p7 = pnand %p2253_p6, %p2247_p3 }
  0x11   :  { %2257 = shalt.err (!%p2254_p7)
}
  0x12   :  { %s2403_s7 = smov 256   ;;  %s2404_s8 = smov 16  }
  0x13   :  { %38 = dma.hbm_to_vmem [thread:$0]  %s2712_s1, 8192, %s33_s22, [#allocation8], %s2403_s7, %s2403_s7, %s2404_s8  }
  0x14   :  { %s2405_s11 = smov [#allocation4]   ;;  %s2258_s15 = scalar_lea.hbm %s2711_s0, 1024 }
  0x15   :  { %s20_s12 = sshll.u32 %s2405_s11, 4  ;;  %p2259_p8 = scmp.ne.s32.totalorder %s2711_s0, %s2258_s15  ;;  %s21_s12 = int_to_ptr.vmem [resolvable:$true] %s20_s12 }
  0x16   :  { %p2262_p9 = scmp.lt.u32.totalorder %s2258_s15, %s2711_s0 }
  0x18   :  { %p2264_p10 = pnand %p2262_p9, %p2259_p8 }
  0x1a   :  { %2267 = shalt.err (!%p2264_p10)
}
  0x1b   :  { %s2268_s20 = scalar_lea.vmem %s21_s12, 1024  ;;  %p2273_p12 = scmp.lt.s32.totalorder %s21_s12, %s21_s12 }
  0x1c   :  { %p2269_p11 = scmp.ne.s32.totalorder %s21_s12, %s2268_s20  ;;  %p2274_p13 = scmp.lt.s32.totalorder %s2268_s20, %s2268_s20 }
  0x1e   :  { %p2275_p0 = por %p2274_p13, %p2273_p12 }
  0x20   :  { %p2276_p1 = pnand %p2275_p0, %p2269_p11 }
  0x22   :  { %2279 = shalt.err (!%p2276_p1)
}
  0x23   :  { %s2406_s1 = smov 128   ;;  %s2407_s21 = smov 8  }
  0x24   :  { %26 = dma.hbm_to_vmem [thread:$0]  %s2711_s0, 1024, %s21_s12, [#allocation5], %s2406_s1, %s2406_s1, %s2407_s21  }
  0x25   :  { %s2408_s24 = smov [#allocation9]   ;;  %s2409_s26 = smov [#allocation10]  }
  0x26   :  { %s44_s25 = sshll.u32 %s2408_s24, 4  ;;  %s58_s27 = sshll.u32 %s2409_s26, 4  ;;  %s45_s25 = int_to_ptr.vmem [resolvable:$true] %s44_s25  ;;  %s2481_s27 = int_to_ptr.vmem [resolvable:$true] %s58_s27 }
  0x27   :  { %s2280_s30 = scalar_lea.hbm %s2713_s2, 8192 }
  0x28   :  { %p2281_p2 = scmp.ne.s32.totalorder %s2713_s2, %s2280_s30  ;;  %p2284_p3 = scmp.lt.u32.totalorder %s2280_s30, %s2713_s2 }
  0x2a   :  { %p2286_p4 = pnand %p2284_p3, %p2281_p2 }
  0x2c   :  { %2289 = shalt.err (!%p2286_p4)
}
  0x2d   :  { %s2290_s0 = scalar_lea.vmem %s45_s25, 8192  ;;  %p2295_p6 = scmp.lt.s32.totalorder %s45_s25, %s45_s25 }
  0x2e   :  { %p2291_p5 = scmp.ne.s32.totalorder %s45_s25, %s2290_s0  ;;  %p2296_p7 = scmp.lt.s32.totalorder %s2290_s0, %s2290_s0 }
  0x30   :  { %p2297_p8 = por %p2296_p7, %p2295_p6 }
  0x32   :  { %p2298_p9 = pnand %p2297_p8, %p2291_p5 }
  0x34   :  { %2301 = shalt.err (!%p2298_p9)
}
  0x35   :  { %50 = dma.hbm_to_vmem [thread:$0]  %s2713_s2, 8192, %s45_s25, [#allocation8], %s2403_s7, %s2403_s7, %s2404_s8  }
  0x36   :  { %s2302_s17 = scalar_lea.hbm %s2715_s4, 1024 }
  0x37   :  { %p2303_p10 = scmp.ne.s32.totalorder %s2715_s4, %s2302_s17  ;;  %p2306_p11 = scmp.lt.u32.totalorder %s2302_s17, %s2715_s4 }
  0x39   :  { %p2308_p12 = pnand %p2306_p11, %p2303_p10 }
  0x3b   :  { %2311 = shalt.err (!%p2308_p12)
}
  0x3c   :  { %s2312_s23 = scalar_lea.vmem %s2481_s27, 1024  ;;  %p2317_p0 = scmp.lt.s32.totalorder %s2481_s27, %s2481_s27 }
  0x3d   :  { %p2313_p13 = scmp.ne.s32.totalorder %s2481_s27, %s2312_s23  ;;  %p2318_p1 = scmp.lt.s32.totalorder %s2312_s23, %s2312_s23 }
  0x3f   :  { %p2319_p2 = por %p2318_p1, %p2317_p0 }
  0x41   :  { %p2320_p3 = pnand %p2319_p2, %p2313_p13 }
  0x43   :  { %2323 = shalt.err (!%p2320_p3)
}
  0x44   :  { %s2410_s2 = smov 64   ;;  %s2411_s7 = smov 4  }
  0x45   :  { %64 = dma.hbm_to_vmem [thread:$0]  %s2715_s4, 1024, %s2481_s27, [#allocation11], %s2410_s2, %s2410_s2, %s2411_s7  }
  0x46   :  { %2370 = dma.done.wait [#allocation5], 1024  }
  0x47   :  { %2371 = vsyncadd [#allocation5], 4294966272 }
  0x48   :  { %2372 = dma.done.wait [#allocation8], 16384  }
  0x49   :  { %2373 = vsyncadd [#allocation8], 4294950912 }
  0x4a   :  { %2374 = dma.done.wait [#allocation11], 1024  }
  0x4b   :  { %2375 = vsyncadd [#allocation11], 4294966272  ;;  %v2412_v0 = vmov 0   ;;  %v2004_v1 = vld [vmem:[#allocation7 + $0x4] ss:$16 sps:$4 sm:$0xff]   ;;  %v81_v34 = vld [vmem:[#allocation4 + $0x8] sm:$0xff]  ;;  %v126_v45 = vlaneseq }
  0x4c   :  { %338 = vmatprep.mubr.bf16.mxu0 %v2412_v0  ;;  %411 = vmatprep.mubr.bf16.mxu1 %v2412_v0  ;;  %v2006_v2 = vld [vmem:[#allocation7 + $0xc] ss:$16 sps:$4 sm:$0xff]   ;;  %v2008_v3 = vld [vmem:[#allocation7] ss:$16 sps:$4 sm:$0xff]   ;;  %v2009_v4 = vld [vmem:[#allocation7 + $0x8] ss:$16 sps:$4 sm:$0xff]  }
  0x4d   :  { %306 = vmatprep.subr.bf16.mxu0 %v2004_v1  ;;  %379 = vmatprep.subr.bf16.mxu1 %v2006_v2  ;;  %v2010_v5 = vld [vmem:[#allocation7 + $0x24] ss:$16 sps:$4 sm:$0xff]   ;;  %v2012_v6 = vld [vmem:[#allocation7 + $0x2c] ss:$16 sps:$4 sm:$0xff]   ;;  %v2014_v7 = vld [vmem:[#allocation7 + $0x20] ss:$16 sps:$4 sm:$0xff]  }
  0x4e   :  { %307 = vmatpush1.bf16.msra.mxu0 %v2008_v3  ;;  %380 = vmatpush1.bf16.msra.mxu1 %v2009_v4  ;;  %v2015_v8 = vld [vmem:[#allocation7 + $0x28] ss:$16 sps:$4 sm:$0xff]   ;;  %v2016_v9 = vld [vmem:[#allocation7 + $0x44] ss:$16 sps:$4 sm:$0xff]   ;;  %v2018_v10 = vld [vmem:[#allocation7 + $0x4c] ss:$16 sps:$4 sm:$0xff]  }
  0x4f   :  { %308 = vmatprep.subr.bf16.mxu0 %v2010_v5  ;;  %381 = vmatprep.subr.bf16.mxu1 %v2012_v6  ;;  %v2020_v11 = vld [vmem:[#allocation7 + $0x40] ss:$16 sps:$4 sm:$0xff]   ;;  %v2021_v12 = vld [vmem:[#allocation7 + $0x48] ss:$16 sps:$4 sm:$0xff]   ;;  %v2022_v13 = vld [vmem:[#allocation7 + $0x64] ss:$16 sps:$4 sm:$0xff]  }
  0x50   :  { %v2024_v14 = vld [vmem:[#allocation7 + $0x6c] ss:$16 sps:$4 sm:$0xff]   ;;  %v2026_v15 = vld [vmem:[#allocation7 + $0x60] ss:$16 sps:$4 sm:$0xff]   ;;  %v2027_v16 = vld [vmem:[#allocation7 + $0x68] ss:$16 sps:$4 sm:$0xff]  }
  0x51   :  { %v2028_v17 = vld [vmem:[#allocation7 + $0x84] ss:$16 sps:$4 sm:$0xff]   ;;  %v2030_v18 = vld [vmem:[#allocation7 + $0x8c] ss:$16 sps:$4 sm:$0xff]   ;;  %v2032_v19 = vld [vmem:[#allocation7 + $0x80] ss:$16 sps:$4 sm:$0xff]  }
  0x52   :  { %309 = vmatpush1.bf16.msra.mxu0 %v2014_v7  ;;  %382 = vmatpush1.bf16.msra.mxu1 %v2015_v8  ;;  %v2033_v20 = vld [vmem:[#allocation7 + $0x88] ss:$16 sps:$4 sm:$0xff]   ;;  %v2034_v21 = vld [vmem:[#allocation7 + $0xa4] ss:$16 sps:$4 sm:$0xff]   ;;  %v2036_v22 = vld [vmem:[#allocation7 + $0xac] ss:$16 sps:$4 sm:$0xff]  }
  0x53   :  { %310 = vmatprep.subr.bf16.mxu0 %v2016_v9  ;;  %383 = vmatprep.subr.bf16.mxu1 %v2018_v10  ;;  %v2038_v23 = vld [vmem:[#allocation7 + $0xa0] ss:$16 sps:$4 sm:$0xff]   ;;  %v2039_v24 = vld [vmem:[#allocation7 + $0xa8] ss:$16 sps:$4 sm:$0xff]   ;;  %v2040_v25 = vld [vmem:[#allocation7 + $0xc4] ss:$16 sps:$4 sm:$0xff]  }
  0x54   :  { %v2042_v26 = vld [vmem:[#allocation7 + $0xcc] ss:$16 sps:$4 sm:$0xff]   ;;  %v2044_v27 = vld [vmem:[#allocation7 + $0xc0] ss:$16 sps:$4 sm:$0xff]   ;;  %v2045_v28 = vld [vmem:[#allocation7 + $0xc8] ss:$16 sps:$4 sm:$0xff]  }
  0x55   :  { %v2046_v29 = vld [vmem:[#allocation7 + $0xe4] ss:$16 sps:$4 sm:$0xff]   ;;  %v2048_v30 = vld [vmem:[#allocation7 + $0xec] ss:$16 sps:$4 sm:$0xff]   ;;  %v2050_v31 = vld [vmem:[#allocation7 + $0xe0] ss:$16 sps:$4 sm:$0xff]  }
  0x56   :  { %311 = vmatpush1.bf16.msra.mxu0 %v2020_v11  ;;  %384 = vmatpush1.bf16.msra.mxu1 %v2021_v12  ;;  %v2051_v32 = vld [vmem:[#allocation7 + $0xe8] ss:$16 sps:$4 sm:$0xff]   ;;  %v80_v33 = vld [vmem:[#allocation4] sm:$0xff]  ;;  %v82_v36 = vld [vmem:[#allocation4 + $0x10] sm:$0xff]  ;;  %v2523_v46 = vshrl.u32 %v126_v45, 7  ;;  %s2584_s26 = smov 0  }
  0x57   :  { %312 = vmatprep.subr.bf16.mxu0 %v2022_v13  ;;  %385 = vmatprep.subr.bf16.mxu1 %v2024_v14  ;;  %v88_v35 = vpack.c.bf16 %v81_v34, %v80_v33  ;;  %v83_v37 = vld [vmem:[#allocation4 + $0x18] sm:$0xff]  ;;  %v84_v39 = vld [vmem:[#allocation4 + $0x20] sm:$0xff]  ;;  %v85_v40 = vld [vmem:[#allocation4 + $0x28] sm:$0xff] }
  0x58   :  { %v89_v38 = vpack.c.bf16 %v83_v37, %v82_v36  ;;  %v90_v41 = vpack.c.bf16 %v85_v40, %v84_v39  ;;  %v86_v42 = vld [vmem:[#allocation4 + $0x30] sm:$0xff]  ;;  %v87_v43 = vld [vmem:[#allocation4 + $0x38] sm:$0xff]  ;;  %v128_v47 = vsub.s32 0, %v2523_v46  ;;  %v136_v48 = vsub.s32 2, %v2523_v46  ;;  %v124_v49 = vld [vmem:[%s2714_s3] sm:$0xf] }
  0x59   :  { %v91_v44 = vpack.c.bf16 %v87_v43, %v86_v42  ;;  %v132_v50 = vsub.s32 1, %v2523_v46  ;;  %v140_v51 = vsub.s32 3, %v2523_v46 }
  0x5a   :  { %313 = vmatpush1.bf16.msra.mxu0 %v2026_v15  ;;  %386 = vmatpush1.bf16.msra.mxu1 %v2027_v16  ;;  %v2534_v52 = vrot.slane %v124_v49, %v128_v47  ;;  %v2538_v53 = vrot.slane %v124_v49, %v136_v48 }
  0x5b   :  { %314 = vmatprep.subr.bf16.mxu0 %v2028_v17  ;;  %387 = vmatprep.subr.bf16.mxu1 %v2030_v18  ;;  %v2542_v54 = vrot.slane %v124_v49, %v132_v50  ;;  %v2546_v55 = vrot.slane %v124_v49, %v140_v51 }
  0x5e   :  { %315 = vmatpush1.bf16.msra.mxu0 %v2032_v19  ;;  %388 = vmatpush1.bf16.msra.mxu1 %v2033_v20 }
  0x5f   :  { %316 = vmatprep.subr.bf16.mxu0 %v2034_v21  ;;  %389 = vmatprep.subr.bf16.mxu1 %v2036_v22 }
  0x62   :  { %317 = vmatpush1.bf16.msra.mxu0 %v2038_v23  ;;  %390 = vmatpush1.bf16.msra.mxu1 %v2039_v24 }
  0x63   :  { %318 = vmatprep.subr.bf16.mxu0 %v2040_v25  ;;  %391 = vmatprep.subr.bf16.mxu1 %v2042_v26 }
  0x66   :  { %319 = vmatpush1.bf16.msra.mxu0 %v2044_v27  ;;  %392 = vmatpush1.bf16.msra.mxu1 %v2045_v28 }
  0x67   :  { %320 = vmatprep.subr.bf16.mxu0 %v2046_v29  ;;  %393 = vmatprep.subr.bf16.mxu1 %v2048_v30 }
  0x6a   :  { %321 = vmatpush1.bf16.msra.mxu0 %v2050_v31  ;;  %394 = vmatpush1.bf16.msra.mxu1 %v2051_v32 }
  0x6d   :  { %339 = vmatmul.mubr.bf16.vlgmr.msra.gmra.mrb[0].mxu0 %v88_v35  ;;  %412 = vmatmul.mubr.bf16.vlgmr.msra.gmra.mrb[0].mxu1 %v88_v35 }
  0x6e   :  { %348 = vmatprep.mubr.bf16.mxu0 %v2412_v0  ;;  %421 = vmatprep.mubr.bf16.mxu1 %v2412_v0 }
  0x75   :  { %349 = vmatmul.mubr.bf16.gmra.mrb[4].mxu0 %v89_v38  ;;  %422 = vmatmul.mubr.bf16.gmra.mrb[4].mxu1 %v89_v38 }
  0x76   :  { %358 = vmatprep.mubr.bf16.mxu0 %v2412_v0  ;;  %431 = vmatprep.mubr.bf16.mxu1 %v2412_v0 }
  0x7d   :  { %359 = vmatmul.mubr.bf16.gmra.mrb[8].mxu0 %v90_v41  ;;  %432 = vmatmul.mubr.bf16.gmra.mrb[8].mxu1 %v90_v41 }
  0x7e   :  { %368 = vmatprep.mubr.bf16.mxu0 %v2412_v0  ;;  %441 = vmatprep.mubr.bf16.mxu1 %v2412_v0 }
  0x85   :  { %369 = vmatmul.mubr.bf16.gmra.mrb[12].mxu0 %v91_v44  ;;  %442 = vmatmul.mubr.bf16.gmra.mrb[12].mxu1 %v91_v44 }
 0x140   :  { %v340_v56 = vpop.f32.mrb[0].mxu0  ;;  %v413_v57 = vpop.f32.mrb[0].mxu1 }
 0x141   :  { %v341_v58 = vadd.f32 %v340_v56, %v2534_v52  ;;  %v414_v59 = vadd.f32 %v413_v57, %v2538_v53  ;;  %v342_v60 = vpop.f32.mrb[1].mxu0  ;;  %v415_v61 = vpop.f32.mrb[1].mxu1 }
 0x142   :  { %v343_v62 = vadd.f32 %v342_v60, %v2542_v54  ;;  %v416_v63 = vadd.f32 %v415_v61, %v2546_v55  ;;  %v344_v1 = vpop.f32.mrb[2].mxu0  ;;  %v417_v2 = vpop.f32.mrb[2].mxu1 }
 0x143   :  { %452 = vst [vmem:[#allocation2] sm:$0xff] %v341_v58  ;;  %454 = vst [vmem:[#allocation2 + $0x10] sm:$0xff] %v414_v59  ;;  %v345_v3 = vadd.f32 %v344_v1, %v2534_v52  ;;  %v418_v4 = vadd.f32 %v417_v2, %v2538_v53  ;;  %v346_v5 = vpop.f32.mrb[3].mxu0  ;;  %v419_v6 = vpop.f32.mrb[3].mxu1 }
 0x144   :  { %453 = vst [vmem:[#allocation2 + $0x8] sm:$0xff] %v343_v62  ;;  %455 = vst [vmem:[#allocation2 + $0x18] sm:$0xff] %v416_v63  ;;  %v347_v7 = vadd.f32 %v346_v5, %v2542_v54  ;;  %v420_v8 = vadd.f32 %v419_v6, %v2546_v55 }
 0x145   :  { %456 = vst [vmem:[#allocation2 + $0x20] sm:$0xff] %v345_v3  ;;  %458 = vst [vmem:[#allocation2 + $0x30] sm:$0xff] %v418_v4  ;;  %v2580_v3 = vmov 0.0   ;;  %v2582_v4 = vmov 0.0  }
 0x146   :  { %457 = vst [vmem:[#allocation2 + $0x28] sm:$0xff] %v347_v7  ;;  %459 = vst [vmem:[#allocation2 + $0x38] sm:$0xff] %v420_v8 }
 0x148   :  { %v350_v9 = vpop.f32.mrb[4].mxu0  ;;  %v423_v10 = vpop.f32.mrb[4].mxu1 }
 0x149   :  { %v351_v11 = vadd.f32 %v350_v9, %v2534_v52  ;;  %v424_v12 = vadd.f32 %v423_v10, %v2538_v53  ;;  %v352_v13 = vpop.f32.mrb[5].mxu0  ;;  %v425_v14 = vpop.f32.mrb[5].mxu1 }
 0x14a   :  { %v353_v15 = vadd.f32 %v352_v13, %v2542_v54  ;;  %v426_v16 = vadd.f32 %v425_v14, %v2546_v55  ;;  %v354_v17 = vpop.f32.mrb[6].mxu0  ;;  %v427_v18 = vpop.f32.mrb[6].mxu1 }
 0x14b   :  { %460 = vst [vmem:[#allocation2 + $0x40] sm:$0xff] %v351_v11  ;;  %462 = vst [vmem:[#allocation2 + $0x50] sm:$0xff] %v424_v12  ;;  %v355_v19 = vadd.f32 %v354_v17, %v2534_v52  ;;  %v428_v20 = vadd.f32 %v427_v18, %v2538_v53  ;;  %v356_v21 = vpop.f32.mrb[7].mxu0  ;;  %v429_v22 = vpop.f32.mrb[7].mxu1 }
 0x14c   :  { %461 = vst [vmem:[#allocation2 + $0x48] sm:$0xff] %v353_v15  ;;  %463 = vst [vmem:[#allocation2 + $0x58] sm:$0xff] %v426_v16  ;;  %v357_v23 = vadd.f32 %v356_v21, %v2542_v54  ;;  %v430_v24 = vadd.f32 %v429_v22, %v2546_v55 }
 0x14d   :  { %464 = vst [vmem:[#allocation2 + $0x60] sm:$0xff] %v355_v19  ;;  %466 = vst [vmem:[#allocation2 + $0x70] sm:$0xff] %v428_v20 }
 0x14e   :  { %465 = vst [vmem:[#allocation2 + $0x68] sm:$0xff] %v357_v23  ;;  %467 = vst [vmem:[#allocation2 + $0x78] sm:$0xff] %v430_v24 }
 0x150   :  { %v360_v25 = vpop.f32.mrb[8].mxu0  ;;  %v433_v26 = vpop.f32.mrb[8].mxu1 }
 0x151   :  { %v361_v27 = vadd.f32 %v360_v25, %v2534_v52  ;;  %v434_v28 = vadd.f32 %v433_v26, %v2538_v53  ;;  %v362_v29 = vpop.f32.mrb[9].mxu0  ;;  %v435_v30 = vpop.f32.mrb[9].mxu1 }
 0x152   :  { %v363_v31 = vadd.f32 %v362_v29, %v2542_v54  ;;  %v436_v32 = vadd.f32 %v435_v30, %v2546_v55  ;;  %v364_v33 = vpop.f32.mrb[10].mxu0  ;;  %v437_v34 = vpop.f32.mrb[10].mxu1 }
 0x153   :  { %468 = vst [vmem:[#allocation2 + $0x80] sm:$0xff] %v361_v27  ;;  %470 = vst [vmem:[#allocation2 + $0x90] sm:$0xff] %v434_v28  ;;  %v365_v35 = vadd.f32 %v364_v33, %v2534_v52  ;;  %v438_v36 = vadd.f32 %v437_v34, %v2538_v53  ;;  %v366_v37 = vpop.f32.mrb[11].mxu0  ;;  %v439_v38 = vpop.f32.mrb[11].mxu1 }
 0x154   :  { %469 = vst [vmem:[#allocation2 + $0x88] sm:$0xff] %v363_v31  ;;  %471 = vst [vmem:[#allocation2 + $0x98] sm:$0xff] %v436_v32  ;;  %v367_v39 = vadd.f32 %v366_v37, %v2542_v54  ;;  %v440_v40 = vadd.f32 %v439_v38, %v2546_v55 }
 0x155   :  { %472 = vst [vmem:[#allocation2 + $0xa0] sm:$0xff] %v365_v35  ;;  %474 = vst [vmem:[#allocation2 + $0xb0] sm:$0xff] %v438_v36 }
 0x156   :  { %473 = vst [vmem:[#allocation2 + $0xa8] sm:$0xff] %v367_v39  ;;  %475 = vst [vmem:[#allocation2 + $0xb8] sm:$0xff] %v440_v40 }
 0x158   :  { %v370_v41 = vpop.f32.mrb[12].mxu0  ;;  %v443_v42 = vpop.f32.mrb[12].mxu1 }
 0x159   :  { %v371_v43 = vadd.f32 %v370_v41, %v2534_v52  ;;  %v444_v44 = vadd.f32 %v443_v42, %v2538_v53  ;;  %v372_v45 = vpop.f32.mrb[13].mxu0  ;;  %v445_v49 = vpop.f32.mrb[13].mxu1 }
 0x15a   :  { %v373_v56 = vadd.f32 %v372_v45, %v2542_v54  ;;  %v446_v57 = vadd.f32 %v445_v49, %v2546_v55  ;;  %v374_v58 = vpop.f32.mrb[14].mxu0  ;;  %v447_v59 = vpop.f32.mrb[14].mxu1 }
 0x15b   :  { %476 = vst [vmem:[#allocation2 + $0xc0] sm:$0xff] %v371_v43  ;;  %478 = vst [vmem:[#allocation2 + $0xd0] sm:$0xff] %v444_v44  ;;  %v375_v60 = vadd.f32 %v374_v58, %v2534_v52  ;;  %v448_v61 = vadd.f32 %v447_v59, %v2538_v53  ;;  %v376_v62 = vpop.f32.mrb[15].mxu0  ;;  %v449_v63 = vpop.f32.mrb[15].mxu1 }
 0x15c   :  { %477 = vst [vmem:[#allocation2 + $0xc8] sm:$0xff] %v373_v56  ;;  %479 = vst [vmem:[#allocation2 + $0xd8] sm:$0xff] %v446_v57  ;;  %v377_v1 = vadd.f32 %v376_v62, %v2542_v54  ;;  %v450_v2 = vadd.f32 %v449_v63, %v2546_v55 }
 0x15d   :  { %480 = vst [vmem:[#allocation2 + $0xe0] sm:$0xff] %v375_v60  ;;  %482 = vst [vmem:[#allocation2 + $0xf0] sm:$0xff] %v448_v61 }
 0x15e   :  { %481 = vst [vmem:[#allocation2 + $0xe8] sm:$0xff] %v377_v1  ;;  %483 = vst [vmem:[#allocation2 + $0xf8] sm:$0xff] %v450_v2 }
 0x15f LB: > { %v2052_v52 = vld [vmem:[#allocation9 + $0x4] ss:$16 sps:$4 sm:$0xff]   ;;  %v2054_v53 = vld [vmem:[#allocation9] ss:$16 sps:$4 sm:$0xff]   ;;  %v2413_v54 = vmov 0   ;;  %v499_v33 = vpack.c.bf16 %v2384_v4, %v2384_v4  ;;  %s1888_s27 = sshll.u32 %s2388_s26, 5  ;;  %s2388_s26 = sphi %s2584_s26, %s489_s26   ;;  %v2384_v4 = vphi %v2582_v4, %v801_v4   ;;  %v2380_v3 = vphi %v2580_v3, %v799_v3  }
 0x160   : > { %724 = vmatprep.mubr.bf16.mxu0 %v2413_v54  ;;  %765 = vmatprep.mubr.bf16.mxu1 %v2413_v54  ;;  %v2055_v55 = vld [vmem:[#allocation9 + $0x24] ss:$16 sps:$4 sm:$0xff]   ;;  %v2057_v5 = vld [vmem:[#allocation9 + $0x20] ss:$16 sps:$4 sm:$0xff]   ;;  %v2063_v7 = vld [vmem:[#allocation9 + $0xc] ss:$16 sps:$4 sm:$0xff]  }
 0x161   : > { %692 = vmatprep.subr.bf16.mxu0 %v2052_v52  ;;  %v2058_v6 = vld [vmem:[#allocation9 + $0x44] ss:$16 sps:$4 sm:$0xff]   ;;  %v2066_v8 = vld [vmem:[#allocation9 + $0x8] ss:$16 sps:$4 sm:$0xff]   ;;  %v2060_v9 = vld [vmem:[#allocation9 + $0x40] ss:$16 sps:$4 sm:$0xff]   ;;  %733 = vmatprep.subr.bf16.mxu1 %v2063_v7 }
 0x162   : > { %693 = vmatpush1.bf16.msra.mxu0 %v2054_v53  ;;  %v2061_v10 = vld [vmem:[#allocation9 + $0x64] ss:$16 sps:$4 sm:$0xff]   ;;  %734 = vmatpush1.bf16.msra.mxu1 %v2066_v8  ;;  %v2069_v11 = vld [vmem:[#allocation9 + $0x2c] ss:$16 sps:$4 sm:$0xff]   ;;  %v2072_v12 = vld [vmem:[#allocation9 + $0x28] ss:$16 sps:$4 sm:$0xff]  }
 0x163   : > { %694 = vmatprep.subr.bf16.mxu0 %v2055_v55  ;;  %735 = vmatprep.subr.bf16.mxu1 %v2069_v11  ;;  %v2065_v13 = vld [vmem:[#allocation9 + $0x60] ss:$16 sps:$4 sm:$0xff]   ;;  %v2067_v14 = vld [vmem:[#allocation9 + $0x84] ss:$16 sps:$4 sm:$0xff]   ;;  %v2075_v15 = vld [vmem:[#allocation9 + $0x4c] ss:$16 sps:$4 sm:$0xff]  }
 0x164   : > { %v2078_v16 = vld [vmem:[#allocation9 + $0x48] ss:$16 sps:$4 sm:$0xff]   ;;  %v2081_v17 = vld [vmem:[#allocation9 + $0x6c] ss:$16 sps:$4 sm:$0xff]   ;;  %v2071_v18 = vld [vmem:[#allocation9 + $0x80] ss:$16 sps:$4 sm:$0xff]  }
 0x165   : > { %v2073_v19 = vld [vmem:[#allocation9 + $0xa4] ss:$16 sps:$4 sm:$0xff]   ;;  %v2084_v20 = vld [vmem:[#allocation9 + $0x68] ss:$16 sps:$4 sm:$0xff]   ;;  %v2087_v21 = vld [vmem:[#allocation9 + $0x8c] ss:$16 sps:$4 sm:$0xff]  }
 0x166   : > { %695 = vmatpush1.bf16.msra.mxu0 %v2057_v5  ;;  %736 = vmatpush1.bf16.msra.mxu1 %v2072_v12  ;;  %v2077_v22 = vld [vmem:[#allocation9 + $0xa0] ss:$16 sps:$4 sm:$0xff]   ;;  %v2079_v23 = vld [vmem:[#allocation9 + $0xc4] ss:$16 sps:$4 sm:$0xff]   ;;  %v2090_v24 = vld [vmem:[#allocation9 + $0x88] ss:$16 sps:$4 sm:$0xff]  }
 0x167   : > { %696 = vmatprep.subr.bf16.mxu0 %v2058_v6  ;;  %737 = vmatprep.subr.bf16.mxu1 %v2075_v15  ;;  %v2091_v25 = vld [vmem:[#allocation9 + $0xac] ss:$16 sps:$4 sm:$0xff]   ;;  %v2083_v26 = vld [vmem:[#allocation9 + $0xc0] ss:$16 sps:$4 sm:$0xff]   ;;  %v2085_v27 = vld [vmem:[#allocation9 + $0xe4] ss:$16 sps:$4 sm:$0xff]  }
 0x168   : > { %v2093_v28 = vld [vmem:[#allocation9 + $0xa8] ss:$16 sps:$4 sm:$0xff]   ;;  %v2094_v29 = vld [vmem:[#allocation9 + $0xcc] ss:$16 sps:$4 sm:$0xff]   ;;  %v2089_v30 = vld [vmem:[#allocation9 + $0xe0] ss:$16 sps:$4 sm:$0xff]  }
 0x169   : > { %v2096_v31 = vld [vmem:[#allocation9 + $0xc8] ss:$16 sps:$4 sm:$0xff]   ;;  %v2097_v32 = vld [vmem:[#allocation9 + $0xec] ss:$16 sps:$4 sm:$0xff]   ;;  %s494_s28 = scalar_lea.vmem [#allocation2], %s1888_s27  ;;  %s1807_s29 = sshll.u32 %s2388_s26, 3 }
 0x16a   : > { %697 = vmatpush1.bf16.msra.mxu0 %v2060_v9  ;;  %738 = vmatpush1.bf16.msra.mxu1 %v2078_v16  ;;  %v2099_v34 = vld [vmem:[#allocation9 + $0xe8] ss:$16 sps:$4 sm:$0xff]   ;;  %v495_v35 = vld [vmem:[%s494_s28] sm:$0xff]  ;;  %v497_v60 = vld [vmem:[%s494_s28 + $0x10] sm:$0xff]  ;;  %s803_s30 = scalar_lea.vmem [#allocation3], %s1807_s29  ;;  %s489_s26 = sadd.s32 1, %s2388_s26  }
 0x16b   : > { %698 = vmatprep.subr.bf16.mxu0 %v2061_v10  ;;  %739 = vmatprep.subr.bf16.mxu1 %v2081_v17  ;;  %v496_v36 = vld [vmem:[%s494_s28 + $0x8] sm:$0xff]  ;;  %v498_v45 = vld [vmem:[%s494_s28 + $0x18] sm:$0xff]  ;;  %p486_p4 = scmp.ge.s32.totalorder %s489_s26, 8  }
 0x16c   :  { %v2116_v10 = vld [vmem:[#allocation7 + $0x104] ss:$16 sps:$4 sm:$0xff] (%p486_p4)   ;;  %v2118_v11 = vld [vmem:[#allocation7 + $0x10c] ss:$16 sps:$4 sm:$0xff] (%p486_p4)   ;;  %v2120_v12 = vld [vmem:[#allocation7 + $0x100] ss:$16 sps:$4 sm:$0xff] (%p486_p4)  }
 0x16d   :  { %v2124_v15 = vld [vmem:[#allocation7 + $0x12c] ss:$16 sps:$4 sm:$0xff] (%p486_p4)   ;;  %v2126_v16 = vld [vmem:[#allocation7 + $0x120] ss:$16 sps:$4 sm:$0xff] (%p486_p4)   ;;  %v2127_v17 = vld [vmem:[#allocation7 + $0x128] ss:$16 sps:$4 sm:$0xff] (%p486_p4)  }
 0x16e   : > { %699 = vmatpush1.bf16.msra.mxu0 %v2065_v13  ;;  %740 = vmatpush1.bf16.msra.mxu1 %v2084_v20  ;;  %v2121_v13 = vld [vmem:[#allocation7 + $0x108] ss:$16 sps:$4 sm:$0xff] (%p486_p4)  }
 0x16f   : > { %700 = vmatprep.subr.bf16.mxu0 %v2067_v14  ;;  %741 = vmatprep.subr.bf16.mxu1 %v2087_v21  ;;  %v2122_v14 = vld [vmem:[#allocation7 + $0x124] ss:$16 sps:$4 sm:$0xff] (%p486_p4)   ;;  %v2133_v20 = vld [vmem:[#allocation7 + $0x148] ss:$16 sps:$4 sm:$0xff] (%p486_p4)  }
 0x170   :  { %v2134_v21 = vld [vmem:[#allocation7 + $0x164] ss:$16 sps:$4 sm:$0xff] (%p486_p4)  }
 0x172   : > { %701 = vmatpush1.bf16.msra.mxu0 %v2071_v18  ;;  %742 = vmatpush1.bf16.msra.mxu1 %v2090_v24  ;;  %v2128_v18 = vld [vmem:[#allocation7 + $0x144] ss:$16 sps:$4 sm:$0xff] (%p486_p4)   ;;  %v2139_v24 = vld [vmem:[#allocation7 + $0x168] ss:$16 sps:$4 sm:$0xff] (%p486_p4)  }
 0x173   : > { %702 = vmatprep.subr.bf16.mxu0 %v2073_v19  ;;  %743 = vmatprep.subr.bf16.mxu1 %v2091_v25  ;;  %v2130_v19 = vld [vmem:[#allocation7 + $0x14c] ss:$16 sps:$4 sm:$0xff] (%p486_p4)   ;;  %v2140_v25 = vld [vmem:[#allocation7 + $0x184] ss:$16 sps:$4 sm:$0xff] (%p486_p4)  }
 0x176   : > { %703 = vmatpush1.bf16.msra.mxu0 %v2077_v22  ;;  %744 = vmatpush1.bf16.msra.mxu1 %v2093_v28  ;;  %v2136_v22 = vld [vmem:[#allocation7 + $0x16c] ss:$16 sps:$4 sm:$0xff] (%p486_p4)   ;;  %v2145_v28 = vld [vmem:[#allocation7 + $0x188] ss:$16 sps:$4 sm:$0xff] (%p486_p4)  }
 0x177   : > { %704 = vmatprep.subr.bf16.mxu0 %v2079_v23  ;;  %745 = vmatprep.subr.bf16.mxu1 %v2094_v29  ;;  %v2138_v23 = vld [vmem:[#allocation7 + $0x160] ss:$16 sps:$4 sm:$0xff] (%p486_p4)   ;;  %v2146_v29 = vld [vmem:[#allocation7 + $0x1a4] ss:$16 sps:$4 sm:$0xff] (%p486_p4)  }
 0x17a   : > { %705 = vmatpush1.bf16.msra.mxu0 %v2083_v26  ;;  %746 = vmatpush1.bf16.msra.mxu1 %v2096_v31  ;;  %v2142_v26 = vld [vmem:[#allocation7 + $0x18c] ss:$16 sps:$4 sm:$0xff] (%p486_p4)   ;;  %v2150_v31 = vld [vmem:[#allocation7 + $0x1a0] ss:$16 sps:$4 sm:$0xff] (%p486_p4)  }
 0x17b   : > { %706 = vmatprep.subr.bf16.mxu0 %v2085_v27  ;;  %747 = vmatprep.subr.bf16.mxu1 %v2097_v32  ;;  %v2144_v27 = vld [vmem:[#allocation7 + $0x180] ss:$16 sps:$4 sm:$0xff] (%p486_p4)   ;;  %v2151_v32 = vld [vmem:[#allocation7 + $0x1a8] ss:$16 sps:$4 sm:$0xff] (%p486_p4)  }
 0x17e   : > { %707 = vmatpush1.bf16.msra.mxu0 %v2089_v30  ;;  %748 = vmatpush1.bf16.msra.mxu1 %v2099_v34  ;;  %v2148_v30 = vld [vmem:[#allocation7 + $0x1ac] ss:$16 sps:$4 sm:$0xff] (%p486_p4)  }
 0x17f   :  { %1033 = vmatprep.subr.bf16.mxu0 (%p486_p4), %v2116_v10  ;;  %1106 = vmatprep.subr.bf16.mxu1 (%p486_p4), %v2118_v11  ;;  %v2154_v34 = vld [vmem:[#allocation7 + $0x1cc] ss:$16 sps:$4 sm:$0xff] (%p486_p4)  }
 0x181   : > { %725 = vmatmul.mubr.bf16.vlgmr.msra.gmra.mrb[0].mxu0 %v499_v33  ;;  %766 = vmatmul.mubr.bf16.vlgmr.msra.gmra.mrb[0].mxu1 %v499_v33  ;;  %v2152_v33 = vld [vmem:[#allocation7 + $0x1c4] ss:$16 sps:$4 sm:$0xff] (%p486_p4)  }
 0x182   :  { %1065 = vmatprep.mubr.bf16.mxu0 (%p486_p4), %v2412_v0  ;;  %1138 = vmatprep.mubr.bf16.mxu1 (%p486_p4), %v2412_v0 }
 0x183   :  { %1034 = vmatpush1.bf16.msra.mxu0 (%p486_p4), %v2120_v12  ;;  %1107 = vmatpush1.bf16.msra.mxu1 (%p486_p4), %v2121_v13 }
 0x184   :  { %1035 = vmatprep.subr.bf16.mxu0 (%p486_p4), %v2122_v14  ;;  %1108 = vmatprep.subr.bf16.mxu1 (%p486_p4), %v2124_v15 }
 0x187   :  { %1036 = vmatpush1.bf16.msra.mxu0 (%p486_p4), %v2126_v16  ;;  %1109 = vmatpush1.bf16.msra.mxu1 (%p486_p4), %v2127_v17 }
 0x188   :  { %1037 = vmatprep.subr.bf16.mxu0 (%p486_p4), %v2128_v18  ;;  %1110 = vmatprep.subr.bf16.mxu1 (%p486_p4), %v2130_v19 }
 0x18b   :  { %1111 = vmatpush1.bf16.msra.mxu1 (%p486_p4), %v2133_v20 }
 0x18c   :  { %1112 = vmatprep.subr.bf16.mxu1 (%p486_p4), %v2136_v22 }
 0x18f   :  { %1113 = vmatpush1.bf16.msra.mxu1 (%p486_p4), %v2139_v24 }
 0x190   :  { %1114 = vmatprep.subr.bf16.mxu1 (%p486_p4), %v2142_v26 }
 0x193   :  { %1115 = vmatpush1.bf16.msra.mxu1 (%p486_p4), %v2145_v28 }
 0x194   :  { %1116 = vmatprep.subr.bf16.mxu1 (%p486_p4), %v2148_v30 }
 0x197   :  { %1117 = vmatpush1.bf16.msra.mxu1 (%p486_p4), %v2151_v32 }
 0x198   :  { %1118 = vmatprep.subr.bf16.mxu1 (%p486_p4), %v2154_v34 }
 0x254   : > { %v726_v37 = vpop.f32.mrb[0].mxu0  ;;  %v767_v49 = vpop.f32.mrb[0].mxu1 }
 0x255   : > { %v774_v38 = vadd.f32 %v726_v37, %v495_v35  ;;  %v728_v39 = vpop.f32.mrb[1].mxu0  ;;  %v769_v56 = vpop.f32.mrb[1].mxu1  ;;  %v776_v62 = vadd.f32 %v767_v49, %v497_v60  ;;  %v2156_v35 = vld [vmem:[#allocation7 + $0x1c0] ss:$16 sps:$4 sm:$0xff] (%p486_p4)   ;;  %v2158_v37 = vld [vmem:[#allocation7 + $0x1e4] ss:$16 sps:$4 sm:$0xff] (%p486_p4)  }
 0x256   : > { %v775_v40 = vadd.f32 %v728_v39, %v496_v36  ;;  %v730_v41 = vpop.f32.mrb[2].mxu0  ;;  %v777_v57 = vadd.f32 %v769_v56, %v498_v45  ;;  %v771_v58 = vpop.f32.mrb[2].mxu1  ;;  %v2157_v36 = vld [vmem:[#allocation7 + $0x1c8] ss:$16 sps:$4 sm:$0xff] (%p486_p4)   ;;  %v2162_v39 = vld [vmem:[#allocation7 + $0x1e0] ss:$16 sps:$4 sm:$0xff] (%p486_p4)  }
 0x257   : > { %v1804_v42 = vmul.f32 -1.442695, %v774_v38  ;;  %v731_v43 = vpop.f32.mrb[3].mxu0  ;;  %v772_v59 = vpop.f32.mrb[3].mxu1  ;;  %v2160_v38 = vld [vmem:[#allocation7 + $0x1ec] ss:$16 sps:$4 sm:$0xff] (%p486_p4)   ;;  %1119 = vmatpush1.bf16.msra.mxu1 (%p486_p4), %v2157_v36 }
 0x258   : > { %v1805_v44 = vmul.f32 -1.442695, %v775_v40  ;;  %v1806_v61 = vmul.f32 -1.442695, %v777_v57  ;;  %v2163_v40 = vld [vmem:[#allocation7 + $0x1e8] ss:$16 sps:$4 sm:$0xff] (%p486_p4)   ;;  %1120 = vmatprep.subr.bf16.mxu1 (%p486_p4), %v2160_v38 }
 0x259   : > { %2100 = vpow2.f32 %v1804_v42 }
 0x25a   : > { %2102 = vpow2.f32 %v1805_v44 }
 0x25b   : > { %2104 = vpow2.f32 %v1806_v61  ;;  %1121 = vmatpush1.bf16.msra.mxu1 (%p486_p4), %v2163_v40 }
 0x25c   : > { %2106 = vtanh.f32 %v776_v62  ;;  %v1808_v62 = vld [vmem:[%s2714_s3 + $0x4] sm:$0xf] (%p486_p4)  ;;  %s2670_s3 = smov (%p486_p4), 0  }
 0x263   : > { %v2101_v63 = vpop.eup %2100 }
 0x264   : > { %v2103_v1 = vpop.eup %2102  ;;  %v781_v2 = vadd.f32 1.0, %v2101_v63  ;;  %v2620_v63 = vrot.slane (%p486_p4), %v1808_v62, %v128_v47 }
 0x265   : > { %v787_v4 = vadd.f32 1.0, %v2103_v1  ;;  %v2105_v52 = vpop.eup %2104  ;;  %v2624_v1 = vrot.slane (%p486_p4), %v1808_v62, %v136_v48 }
 0x266   : > { %2108 = vrcp.f32 %v781_v2  ;;  %v2107_v53 = vpop.eup %2106  ;;  %v794_v55 = vadd.f32 1.0, %v2105_v52  ;;  %v2632_v2 = vrot.slane (%p486_p4), %v1808_v62, %v140_v51 }
 0x267   : > { %2110 = vrcp.f32 %v787_v4 }
 0x268   : > { %2112 = vrcp.f32 %v794_v55 }
 0x270   : > { %v2109_v54 = vpop.eup %2108 }
 0x271   : > { %v2111_v5 = vpop.eup %2110  ;;  %v798_v6 = vmul.f32 %v2109_v54, %v2107_v53 }
 0x272   : > { %v797_v7 = vmul.f32 %v2380_v3, %v2111_v5  ;;  %v2113_v8 = vpop.eup %2112 }
 0x274   : > { %v799_v3 = vadd.f32 %v798_v6, %v797_v7  }
 0x276   : > { %2114 = vtanh.f32 %v799_v3  ;;  %v2132_v3 = vld [vmem:[#allocation7 + $0x140] ss:$16 sps:$4 sm:$0xff] (%p486_p4)  }
 0x277   :  { %1038 = vmatpush1.bf16.msra.mxu0 (%p486_p4), %v2132_v3 }
 0x278   :  { %1039 = vmatprep.subr.bf16.mxu0 (%p486_p4), %v2134_v21 }
 0x27b   :  { %1040 = vmatpush1.bf16.msra.mxu0 (%p486_p4), %v2138_v23 }
 0x27c   :  { %1041 = vmatprep.subr.bf16.mxu0 (%p486_p4), %v2140_v25 }
 0x27d   :  { %488 = sbr.rel (!%p486_p4) target bundleno = 351 (0x15f), region = 81 }
 0x27f   :  { %1042 = vmatpush1.bf16.msra.mxu0 (%p486_p4), %v2144_v27 }
 0x280   : > { %v2115_v9 = vpop.eup %2114  ;;  %1043 = vmatprep.subr.bf16.mxu0 (%p486_p4), %v2146_v29 }
 0x281   : > { %v801_v4 = vmul.f32 %v2115_v9, %v2113_v8  }
 0x283   : > { %804 = vst [vmem:[%s803_s30] sm:$0xff] %v801_v4  ;;  %1044 = vmatpush1.bf16.msra.mxu0 (%p486_p4), %v2150_v31 }
 0x284   :  { %1045 = vmatprep.subr.bf16.mxu0 %v2152_v33 }
 0x287   :  { %1046 = vmatpush1.bf16.msra.mxu0 %v2156_v35 }
 0x288   :  { %1047 = vmatprep.subr.bf16.mxu0 %v2158_v37 }
 0x28a   :  { %v805_v41 = vld [vmem:[#allocation3] sm:$0xff]  ;;  %v806_v42 = vld [vmem:[#allocation3 + $0x8] sm:$0xff]  ;;  %v807_v44 = vld [vmem:[#allocation3 + $0x10] sm:$0xff] }
 0x28b   :  { %v813_v43 = vpack.c.bf16 %v806_v42, %v805_v41  ;;  %1048 = vmatpush1.bf16.msra.mxu0 %v2162_v39  ;;  %v808_v45 = vld [vmem:[#allocation3 + $0x18] sm:$0xff]  ;;  %v809_v56 = vld [vmem:[#allocation3 + $0x20] sm:$0xff]  ;;  %v810_v57 = vld [vmem:[#allocation3 + $0x28] sm:$0xff] }
 0x28c   :  { %v814_v49 = vpack.c.bf16 %v808_v45, %v807_v44  ;;  %v815_v58 = vpack.c.bf16 %v810_v57, %v809_v56  ;;  %v811_v59 = vld [vmem:[#allocation3 + $0x30] sm:$0xff]  ;;  %v812_v60 = vld [vmem:[#allocation3 + $0x38] sm:$0xff] }
 0x28d   :  { %1139 = vmatmul.mubr.bf16.vlgmr.msra.gmra.mrb[0].mxu1 %v813_v43  ;;  %v816_v61 = vpack.c.bf16 %v812_v60, %v811_v59 }
 0x28e   :  { %1066 = vmatmul.mubr.bf16.vlgmr.msra.gmra.mrb[0].mxu0 %v813_v43  ;;  %1148 = vmatprep.mubr.bf16.mxu1 %v2412_v0 }
 0x28f   :  { %1075 = vmatprep.mubr.bf16.mxu0 %v2412_v0 }
 0x295   :  { %1149 = vmatmul.mubr.bf16.gmra.mrb[4].mxu1 %v814_v49 }
 0x296   :  { %1076 = vmatmul.mubr.bf16.gmra.mrb[4].mxu0 %v814_v49  ;;  %1158 = vmatprep.mubr.bf16.mxu1 %v2412_v0 }
 0x297   :  { %1085 = vmatprep.mubr.bf16.mxu0 %v2412_v0 }
 0x29d   :  { %1159 = vmatmul.mubr.bf16.gmra.mrb[8].mxu1 %v815_v58 }
 0x29e   :  { %1086 = vmatmul.mubr.bf16.gmra.mrb[8].mxu0 %v815_v58  ;;  %1168 = vmatprep.mubr.bf16.mxu1 %v2412_v0 }
 0x29f   :  { %1095 = vmatprep.mubr.bf16.mxu0 %v2412_v0  ;;  %v2628_v0 = vrot.slane %v1808_v62, %v132_v50 }
 0x2a5   :  { %1169 = vmatmul.mubr.bf16.gmra.mrb[12].mxu1 %v816_v61 }
 0x2a6   :  { %1096 = vmatmul.mubr.bf16.gmra.mrb[12].mxu0 %v816_v61 }
 0x360   :  { %v1140_v52 = vpop.f32.mrb[0].mxu1 }
 0x361   :  { %v1067_v4 = vpop.f32.mrb[0].mxu0  ;;  %v1141_v54 = vadd.f32 %v1140_v52, %v2624_v1  ;;  %v1142_v55 = vpop.f32.mrb[1].mxu1 }
 0x362   :  { %v1068_v53 = vadd.f32 %v1067_v4, %v2620_v63  ;;  %v1069_v47 = vpop.f32.mrb[1].mxu0  ;;  %v1143_v48 = vadd.f32 %v1142_v55, %v2632_v2  ;;  %v1144_v7 = vpop.f32.mrb[2].mxu1  ;;  %v2668_v55 = vmov 0.0  }
 0x363   :  { %v1070_v5 = vadd.f32 %v1069_v47, %v2628_v0  ;;  %v1071_v6 = vpop.f32.mrb[2].mxu0  ;;  %1181 = vst [vmem:[#allocation2 + $0x10] sm:$0xff] %v1141_v54  ;;  %v1145_v50 = vadd.f32 %v1144_v7, %v2624_v1  ;;  %v1146_v8 = vpop.f32.mrb[3].mxu1  ;;  %v2666_v47 = vmov 0.0  }
 0x364   :  { %1179 = vst [vmem:[#allocation2] sm:$0xff] %v1068_v53  ;;  %v1072_v46 = vadd.f32 %v1071_v6, %v2620_v63  ;;  %v1073_v51 = vpop.f32.mrb[3].mxu0  ;;  %1182 = vst [vmem:[#allocation2 + $0x18] sm:$0xff] %v1143_v48  ;;  %v1147_v10 = vadd.f32 %v1146_v8, %v2632_v2 }
 0x365   :  { %1180 = vst [vmem:[#allocation2 + $0x8] sm:$0xff] %v1070_v5  ;;  %v1074_v9 = vadd.f32 %v1073_v51, %v2628_v0  ;;  %1185 = vst [vmem:[#allocation2 + $0x30] sm:$0xff] %v1145_v50 }
 0x366   :  { %1183 = vst [vmem:[#allocation2 + $0x20] sm:$0xff] %v1072_v46  ;;  %1186 = vst [vmem:[#allocation2 + $0x38] sm:$0xff] %v1147_v10 }
 0x367   :  { %1184 = vst [vmem:[#allocation2 + $0x28] sm:$0xff] %v1074_v9 }
 0x368   :  { %v1150_v12 = vpop.f32.mrb[4].mxu1 }
 0x369   :  { %v1077_v11 = vpop.f32.mrb[4].mxu0  ;;  %v1151_v14 = vadd.f32 %v1150_v12, %v2624_v1  ;;  %v1152_v16 = vpop.f32.mrb[5].mxu1 }
 0x36a   :  { %v1078_v13 = vadd.f32 %v1077_v11, %v2620_v63  ;;  %v1079_v15 = vpop.f32.mrb[5].mxu0  ;;  %v1153_v18 = vadd.f32 %v1152_v16, %v2632_v2  ;;  %v1154_v3 = vpop.f32.mrb[6].mxu1 }
 0x36b   :  { %v1080_v17 = vadd.f32 %v1079_v15, %v2628_v0  ;;  %v1081_v19 = vpop.f32.mrb[6].mxu0  ;;  %1189 = vst [vmem:[#allocation2 + $0x50] sm:$0xff] %v1151_v14  ;;  %v1155_v21 = vadd.f32 %v1154_v3, %v2624_v1  ;;  %v1156_v23 = vpop.f32.mrb[7].mxu1 }
 0x36c   :  { %1187 = vst [vmem:[#allocation2 + $0x40] sm:$0xff] %v1078_v13  ;;  %v1082_v20 = vadd.f32 %v1081_v19, %v2620_v63  ;;  %v1083_v22 = vpop.f32.mrb[7].mxu0  ;;  %1190 = vst [vmem:[#allocation2 + $0x58] sm:$0xff] %v1153_v18  ;;  %v1157_v25 = vadd.f32 %v1156_v23, %v2632_v2 }
 0x36d   :  { %1188 = vst [vmem:[#allocation2 + $0x48] sm:$0xff] %v1080_v17  ;;  %v1084_v24 = vadd.f32 %v1083_v22, %v2628_v0  ;;  %1193 = vst [vmem:[#allocation2 + $0x70] sm:$0xff] %v1155_v21 }
 0x36e   :  { %1191 = vst [vmem:[#allocation2 + $0x60] sm:$0xff] %v1082_v20  ;;  %1194 = vst [vmem:[#allocation2 + $0x78] sm:$0xff] %v1157_v25 }
 0x36f   :  { %1192 = vst [vmem:[#allocation2 + $0x68] sm:$0xff] %v1084_v24 }
 0x370   :  { %v1160_v27 = vpop.f32.mrb[8].mxu1 }
 0x371   :  { %v1087_v26 = vpop.f32.mrb[8].mxu0  ;;  %v1161_v29 = vadd.f32 %v1160_v27, %v2624_v1  ;;  %v1162_v31 = vpop.f32.mrb[9].mxu1 }
 0x372   :  { %v1088_v28 = vadd.f32 %v1087_v26, %v2620_v63  ;;  %v1089_v30 = vpop.f32.mrb[9].mxu0  ;;  %v1163_v33 = vadd.f32 %v1162_v31, %v2632_v2  ;;  %v1164_v35 = vpop.f32.mrb[10].mxu1 }
 0x373   :  { %v1090_v32 = vadd.f32 %v1089_v30, %v2628_v0  ;;  %v1091_v34 = vpop.f32.mrb[10].mxu0  ;;  %1197 = vst [vmem:[#allocation2 + $0x90] sm:$0xff] %v1161_v29  ;;  %v1165_v37 = vadd.f32 %v1164_v35, %v2624_v1  ;;  %v1166_v39 = vpop.f32.mrb[11].mxu1 }
 0x374   :  { %1195 = vst [vmem:[#allocation2 + $0x80] sm:$0xff] %v1088_v28  ;;  %v1092_v36 = vadd.f32 %v1091_v34, %v2620_v63  ;;  %v1093_v38 = vpop.f32.mrb[11].mxu0  ;;  %1198 = vst [vmem:[#allocation2 + $0x98] sm:$0xff] %v1163_v33  ;;  %v1167_v41 = vadd.f32 %v1166_v39, %v2632_v2 }
 0x375   :  { %1196 = vst [vmem:[#allocation2 + $0x88] sm:$0xff] %v1090_v32  ;;  %v1094_v40 = vadd.f32 %v1093_v38, %v2628_v0  ;;  %1201 = vst [vmem:[#allocation2 + $0xb0] sm:$0xff] %v1165_v37 }
 0x376   :  { %1199 = vst [vmem:[#allocation2 + $0xa0] sm:$0xff] %v1092_v36  ;;  %1202 = vst [vmem:[#allocation2 + $0xb8] sm:$0xff] %v1167_v41 }
 0x377   :  { %1200 = vst [vmem:[#allocation2 + $0xa8] sm:$0xff] %v1094_v40 }
 0x378   :  { %v1170_v43 = vpop.f32.mrb[12].mxu1 }
 0x379   :  { %v1097_v42 = vpop.f32.mrb[12].mxu0  ;;  %v1171_v45 = vadd.f32 %v1170_v43, %v2624_v1  ;;  %v1172_v56 = vpop.f32.mrb[13].mxu1 }
 0x37a   :  { %v1098_v44 = vadd.f32 %v1097_v42, %v2620_v63  ;;  %v1099_v49 = vpop.f32.mrb[13].mxu0  ;;  %v1173_v58 = vadd.f32 %v1172_v56, %v2632_v2  ;;  %v1174_v60 = vpop.f32.mrb[14].mxu1 }
 0x37b   :  { %v1100_v57 = vadd.f32 %v1099_v49, %v2628_v0  ;;  %v1101_v59 = vpop.f32.mrb[14].mxu0  ;;  %1205 = vst [vmem:[#allocation2 + $0xd0] sm:$0xff] %v1171_v45  ;;  %v1175_v62 = vadd.f32 %v1174_v60, %v2624_v1  ;;  %v1176_v52 = vpop.f32.mrb[15].mxu1 }
 0x37c   :  { %1203 = vst [vmem:[#allocation2 + $0xc0] sm:$0xff] %v1098_v44  ;;  %v1102_v61 = vadd.f32 %v1101_v59, %v2620_v63  ;;  %v1103_v4 = vpop.f32.mrb[15].mxu0  ;;  %1206 = vst [vmem:[#allocation2 + $0xd8] sm:$0xff] %v1173_v58  ;;  %v1177_v54 = vadd.f32 %v1176_v52, %v2632_v2 }
 0x37d   :  { %1204 = vst [vmem:[#allocation2 + $0xc8] sm:$0xff] %v1100_v57  ;;  %v1104_v53 = vadd.f32 %v1103_v4, %v2628_v0  ;;  %1209 = vst [vmem:[#allocation2 + $0xf0] sm:$0xff] %v1175_v62 }
 0x37e   :  { %1207 = vst [vmem:[#allocation2 + $0xe0] sm:$0xff] %v1102_v61  ;;  %1210 = vst [vmem:[#allocation2 + $0xf8] sm:$0xff] %v1177_v54 }
 0x37f   :  { %1208 = vst [vmem:[#allocation2 + $0xe8] sm:$0xff] %v1104_v53 }
 0x380 LB: > { %v2164_v63 = vld [vmem:[#allocation9 + $0x104] ss:$16 sps:$4 sm:$0xff]   ;;  %v2166_v1 = vld [vmem:[#allocation9 + $0x100] ss:$16 sps:$4 sm:$0xff]   ;;  %v2414_v0 = vmov 0   ;;  %v1226_v28 = vpack.c.bf16 %v2396_v55, %v2396_v55  ;;  %s1889_s11 = sshll.u32 %s2400_s3, 5  ;;  %s2400_s3 = sphi %s2670_s3, %s1216_s3   ;;  %v2396_v55 = vphi %v2668_v55, %v1529_v55   ;;  %v2392_v47 = vphi %v2666_v47, %v1527_v47  }
 0x381   : > { %1452 = vmatprep.mubr.bf16.mxu0 %v2414_v0  ;;  %1493 = vmatprep.mubr.bf16.mxu1 %v2414_v0  ;;  %v2167_v2 = vld [vmem:[#allocation9 + $0x124] ss:$16 sps:$4 sm:$0xff]   ;;  %v2169_v5 = vld [vmem:[#allocation9 + $0x120] ss:$16 sps:$4 sm:$0xff]   ;;  %v2175_v6 = vld [vmem:[#allocation9 + $0x10c] ss:$16 sps:$4 sm:$0xff]  }
 0x382   : > { %1420 = vmatprep.subr.bf16.mxu0 %v2164_v63  ;;  %v2170_v48 = vld [vmem:[#allocation9 + $0x144] ss:$16 sps:$4 sm:$0xff]   ;;  %v2178_v7 = vld [vmem:[#allocation9 + $0x108] ss:$16 sps:$4 sm:$0xff]   ;;  %v2172_v46 = vld [vmem:[#allocation9 + $0x140] ss:$16 sps:$4 sm:$0xff]   ;;  %1461 = vmatprep.subr.bf16.mxu1 %v2175_v6 }
 0x383   : > { %1421 = vmatpush1.bf16.msra.mxu0 %v2166_v1  ;;  %v2173_v50 = vld [vmem:[#allocation9 + $0x164] ss:$16 sps:$4 sm:$0xff]   ;;  %1462 = vmatpush1.bf16.msra.mxu1 %v2178_v7  ;;  %v2181_v51 = vld [vmem:[#allocation9 + $0x12c] ss:$16 sps:$4 sm:$0xff]   ;;  %v2184_v8 = vld [vmem:[#allocation9 + $0x128] ss:$16 sps:$4 sm:$0xff]  }
 0x384   : > { %1422 = vmatprep.subr.bf16.mxu0 %v2167_v2  ;;  %1463 = vmatprep.subr.bf16.mxu1 %v2181_v51  ;;  %v2177_v9 = vld [vmem:[#allocation9 + $0x160] ss:$16 sps:$4 sm:$0xff]   ;;  %v2179_v10 = vld [vmem:[#allocation9 + $0x184] ss:$16 sps:$4 sm:$0xff]   ;;  %v2187_v11 = vld [vmem:[#allocation9 + $0x14c] ss:$16 sps:$4 sm:$0xff]  }
 0x385   : > { %v2190_v12 = vld [vmem:[#allocation9 + $0x148] ss:$16 sps:$4 sm:$0xff]   ;;  %v2193_v13 = vld [vmem:[#allocation9 + $0x16c] ss:$16 sps:$4 sm:$0xff]   ;;  %v2183_v14 = vld [vmem:[#allocation9 + $0x180] ss:$16 sps:$4 sm:$0xff]  }
 0x386   : > { %v2185_v15 = vld [vmem:[#allocation9 + $0x1a4] ss:$16 sps:$4 sm:$0xff]   ;;  %v2196_v16 = vld [vmem:[#allocation9 + $0x168] ss:$16 sps:$4 sm:$0xff]   ;;  %v2199_v17 = vld [vmem:[#allocation9 + $0x18c] ss:$16 sps:$4 sm:$0xff]  }
 0x387   : > { %1423 = vmatpush1.bf16.msra.mxu0 %v2169_v5  ;;  %1464 = vmatpush1.bf16.msra.mxu1 %v2184_v8  ;;  %v2189_v18 = vld [vmem:[#allocation9 + $0x1a0] ss:$16 sps:$4 sm:$0xff]   ;;  %v2191_v19 = vld [vmem:[#allocation9 + $0x1c4] ss:$16 sps:$4 sm:$0xff]   ;;  %v2202_v3 = vld [vmem:[#allocation9 + $0x188] ss:$16 sps:$4 sm:$0xff]  }
 0x388   : > { %1424 = vmatprep.subr.bf16.mxu0 %v2170_v48  ;;  %1465 = vmatprep.subr.bf16.mxu1 %v2187_v11  ;;  %v2203_v20 = vld [vmem:[#allocation9 + $0x1ac] ss:$16 sps:$4 sm:$0xff]   ;;  %v2195_v21 = vld [vmem:[#allocation9 + $0x1c0] ss:$16 sps:$4 sm:$0xff]   ;;  %v2197_v22 = vld [vmem:[#allocation9 + $0x1e4] ss:$16 sps:$4 sm:$0xff]  }
 0x389   : > { %v2205_v23 = vld [vmem:[#allocation9 + $0x1a8] ss:$16 sps:$4 sm:$0xff]   ;;  %v2206_v24 = vld [vmem:[#allocation9 + $0x1cc] ss:$16 sps:$4 sm:$0xff]   ;;  %v2201_v25 = vld [vmem:[#allocation9 + $0x1e0] ss:$16 sps:$4 sm:$0xff]  }
 0x38a   : > { %v2208_v26 = vld [vmem:[#allocation9 + $0x1c8] ss:$16 sps:$4 sm:$0xff]   ;;  %v2209_v27 = vld [vmem:[#allocation9 + $0x1ec] ss:$16 sps:$4 sm:$0xff]   ;;  %s1221_s13 = scalar_lea.vmem [#allocation2], %s1889_s11  ;;  %s1878_s0 = sshll.u32 %s2400_s3, 3 }
 0x38b   : > { %1425 = vmatpush1.bf16.msra.mxu0 %v2172_v46  ;;  %1466 = vmatpush1.bf16.msra.mxu1 %v2190_v12  ;;  %v2211_v29 = vld [vmem:[#allocation9 + $0x1e8] ss:$16 sps:$4 sm:$0xff]   ;;  %v1222_v30 = vld [vmem:[%s1221_s13] sm:$0xff]  ;;  %v1224_v49 = vld [vmem:[%s1221_s13 + $0x10] sm:$0xff]  ;;  %s1531_s12 = scalar_lea.vmem [#allocation3], %s1878_s0  ;;  %s1216_s3 = sadd.s32 1, %s2400_s3  }
 0x38c   : > { %1426 = vmatprep.subr.bf16.mxu0 %v2173_v50  ;;  %1467 = vmatprep.subr.bf16.mxu1 %v2193_v13  ;;  %v1223_v31 = vld [vmem:[%s1221_s13 + $0x8] sm:$0xff]  ;;  %v1225_v40 = vld [vmem:[%s1221_s13 + $0x18] sm:$0xff]  ;;  %p1213_p5 = scmp.ge.s32.totalorder %s1216_s3, 8  }
 0x38d   :  { %v2228_v2 = vld [vmem:[#allocation10] sm:$0xff] (%p1213_p5)   ;;  %v2229_v5 = vld [vmem:[#allocation10 + $0x8] sm:$0xff] (%p1213_p5)   ;;  %v2230_v48 = vld [vmem:[#allocation10 + $0x10] sm:$0xff] (%p1213_p5)   ;;  %s2415_s16 = smov (%p1213_p5), [#allocation12]  }
 0x38e   :  { %v2231_v6 = vld [vmem:[#allocation10 + $0x18] sm:$0xff] (%p1213_p5)   ;;  %v2234_v11 = vld [vmem:[#allocation10 + $0x30] sm:$0xff] (%p1213_p5)   ;;  %s1694_s17 = sshll.u32 (%p1213_p5), %s2415_s16, 4  ;;  %s1695_s17 = int_to_ptr.vmem [resolvable:$true] %s1694_s17 }
 0x38f   : > { %1427 = vmatpush1.bf16.msra.mxu0 %v2177_v9  ;;  %1468 = vmatpush1.bf16.msra.mxu1 %v2196_v16  ;;  %v2235_v12 = vld [vmem:[#allocation10 + $0x38] sm:$0xff] (%p1213_p5)   ;;  %p2329_p7 = scmp.lt.s32.totalorder (%p1213_p5), %s1695_s17, %s1695_s17 }
 0x390   : > { %1428 = vmatprep.subr.bf16.mxu0 %v2179_v10  ;;  %1469 = vmatprep.subr.bf16.mxu1 %v2199_v17  ;;  %v2233_v10 = vld [vmem:[#allocation10 + $0x28] sm:$0xff] (%p1213_p5)  }
 0x393   : > { %1429 = vmatpush1.bf16.msra.mxu0 %v2183_v14  ;;  %1470 = vmatpush1.bf16.msra.mxu1 %v2202_v3 }
 0x394   : > { %1430 = vmatprep.subr.bf16.mxu0 %v2185_v15  ;;  %1471 = vmatprep.subr.bf16.mxu1 %v2203_v20 }
 0x397   : > { %1431 = vmatpush1.bf16.msra.mxu0 %v2189_v18  ;;  %1472 = vmatpush1.bf16.msra.mxu1 %v2205_v23 }
 0x398   : > { %1432 = vmatprep.subr.bf16.mxu0 %v2191_v19  ;;  %1473 = vmatprep.subr.bf16.mxu1 %v2206_v24  ;;  %v1879_v19 = vld [vmem:[%s2716_s5] ss:$0 sm:$0xff] (%p1213_p5)  ;;  %s2324_s5 = scalar_lea.vmem (%p1213_p5), %s1695_s17, 1024 }
 0x399   :  { %p2325_p6 = scmp.ne.s32.totalorder (%p1213_p5), %s1695_s17, %s2324_s5  ;;  %p2330_p8 = scmp.lt.s32.totalorder (%p1213_p5), %s2324_s5, %s2324_s5 }
 0x39b   : > { %1433 = vmatpush1.bf16.msra.mxu0 %v2195_v21  ;;  %1474 = vmatpush1.bf16.msra.mxu1 %v2208_v26  ;;  %p2331_p9 = por (%p1213_p5), %p2330_p8, %p2329_p7 }
 0x39c   : > { %1434 = vmatprep.subr.bf16.mxu0 %v2197_v22  ;;  %1475 = vmatprep.subr.bf16.mxu1 %v2209_v27 }
 0x39d   :  { %p2332_p10 = pnand (%p1213_p5), %p2331_p9, %p2325_p6 }
 0x39f   : > { %1435 = vmatpush1.bf16.msra.mxu0 %v2201_v25  ;;  %1476 = vmatpush1.bf16.msra.mxu1 %v2211_v29 }
 0x3a0   :  { %1902 = vmatprep.subr.bf16.mxu0 (%p1213_p5), %v2228_v2  ;;  %1926 = vmatprep.subr.bf16.mxu1 (%p1213_p5), %v2228_v2 }
 0x3a2   : > { %1453 = vmatmul.mubr.bf16.vlgmr.msra.gmra.mrb[0].mxu0 %v1226_v28  ;;  %1494 = vmatmul.mubr.bf16.vlgmr.msra.gmra.mrb[0].mxu1 %v1226_v28 }
 0x3a3   :  { %1903 = vmatpush3.bf16.msra.mxu0 (%p1213_p5), %v2228_v2  ;;  %1934 = vmatpush3.bf16.msra.mxu1 (%p1213_p5), %v2228_v2 }
 0x3a4   :  { %1904 = vmatprep.subr.bf16.mxu0 (%p1213_p5), %v2229_v5  ;;  %1927 = vmatprep.subr.bf16.mxu1 (%p1213_p5), %v2229_v5 }
 0x3a7   :  { %1905 = vmatpush3.bf16.msra.mxu0 (%p1213_p5), %v2229_v5  ;;  %1935 = vmatpush3.bf16.msra.mxu1 (%p1213_p5), %v2229_v5 }
 0x3a8   :  { %1906 = vmatprep.subr.bf16.mxu0 (%p1213_p5), %v2230_v48  ;;  %1928 = vmatprep.subr.bf16.mxu1 (%p1213_p5), %v2230_v48 }
 0x3ab   :  { %1907 = vmatpush3.bf16.msra.mxu0 (%p1213_p5), %v2230_v48  ;;  %1936 = vmatpush3.bf16.msra.mxu1 (%p1213_p5), %v2230_v48 }
 0x3ac   :  { %1908 = vmatprep.subr.bf16.mxu0 (%p1213_p5), %v2231_v6  ;;  %1929 = vmatprep.subr.bf16.mxu1 (%p1213_p5), %v2231_v6 }
 0x3af   :  { %1909 = vmatpush3.bf16.msra.mxu0 (%p1213_p5), %v2231_v6  ;;  %1937 = vmatpush3.bf16.msra.mxu1 (%p1213_p5), %v2231_v6 }
 0x475   : > { %v1454_v32 = vpop.f32.mrb[0].mxu0  ;;  %v1495_v41 = vpop.f32.mrb[0].mxu1 }
 0x476   : > { %v1502_v33 = vadd.f32 %v1454_v32, %v1222_v30  ;;  %v1456_v34 = vpop.f32.mrb[1].mxu0  ;;  %v1497_v42 = vpop.f32.mrb[1].mxu1  ;;  %v1504_v57 = vadd.f32 %v1495_v41, %v1224_v49 }
 0x477   : > { %v1503_v35 = vadd.f32 %v1456_v34, %v1223_v31  ;;  %v1458_v36 = vpop.f32.mrb[2].mxu0  ;;  %v1505_v43 = vadd.f32 %v1497_v42, %v1225_v40  ;;  %v1499_v44 = vpop.f32.mrb[2].mxu1 }
 0x478   : > { %v1875_v37 = vmul.f32 -1.442695, %v1502_v33  ;;  %v1459_v38 = vpop.f32.mrb[3].mxu0  ;;  %v1500_v45 = vpop.f32.mrb[3].mxu1 }
 0x479   : > { %v1876_v39 = vmul.f32 -1.442695, %v1503_v35  ;;  %v1877_v56 = vmul.f32 -1.442695, %v1505_v43 }
 0x47a   : > { %2212 = vpow2.f32 %v1875_v37 }
 0x47b   : > { %2214 = vpow2.f32 %v1876_v39 }
 0x47c   : > { %2216 = vpow2.f32 %v1877_v56 }
 0x47d   : > { %2218 = vtanh.f32 %v1504_v57 }
 0x484   : > { %v2213_v58 = vpop.eup %2212 }
 0x485   : > { %v2215_v59 = vpop.eup %2214  ;;  %v1509_v60 = vadd.f32 1.0, %v2213_v58 }
 0x486   : > { %v1515_v61 = vadd.f32 1.0, %v2215_v59  ;;  %v2217_v62 = vpop.eup %2216 }
 0x487   : > { %2220 = vrcp.f32 %v1509_v60  ;;  %v2219_v4 = vpop.eup %2218  ;;  %v1522_v53 = vadd.f32 1.0, %v2217_v62 }
 0x488   : > { %2222 = vrcp.f32 %v1515_v61 }
 0x489   : > { %2224 = vrcp.f32 %v1522_v53 }
 0x491   : > { %v2221_v52 = vpop.eup %2220 }
 0x492   : > { %v2223_v54 = vpop.eup %2222  ;;  %v1526_v55 = vmul.f32 %v2221_v52, %v2219_v4 }
 0x493   : > { %v1525_v63 = vmul.f32 %v2392_v47, %v2223_v54  ;;  %v2225_v1 = vpop.eup %2224 }
 0x495   : > { %v1527_v47 = vadd.f32 %v1526_v55, %v1525_v63  }
 0x497   : > { %2226 = vtanh.f32 %v1527_v47  ;;  %v2232_v47 = vld [vmem:[#allocation10 + $0x20] sm:$0xff] (%p1213_p5)  }
 0x498   :  { %1910 = vmatprep.subr.bf16.mxu0 (%p1213_p5), %v2232_v47  ;;  %1930 = vmatprep.subr.bf16.mxu1 (%p1213_p5), %v2232_v47 }
 0x499   :  { %1911 = vmatpush3.bf16.msra.mxu0 (%p1213_p5), %v2232_v47  ;;  %1938 = vmatpush3.bf16.msra.mxu1 (%p1213_p5), %v2232_v47 }
 0x49a   :  { %1912 = vmatprep.subr.bf16.mxu0 (%p1213_p5), %v2233_v10  ;;  %1931 = vmatprep.subr.bf16.mxu1 (%p1213_p5), %v2233_v10 }
 0x49d   :  { %1913 = vmatpush3.bf16.msra.mxu0 (%p1213_p5), %v2233_v10  ;;  %1939 = vmatpush3.bf16.msra.mxu1 (%p1213_p5), %v2233_v10 }
 0x49e   :  { %1215 = sbr.rel (!%p1213_p5) target bundleno = 896 (0x380), region = 92  ;;  %1914 = vmatprep.subr.bf16.mxu0 (%p1213_p5), %v2234_v11  ;;  %1932 = vmatprep.subr.bf16.mxu1 (%p1213_p5), %v2234_v11 }
 0x4a1   : > { %v2227_v0 = vpop.eup %2226  ;;  %1915 = vmatpush3.bf16.msra.mxu0 (%p1213_p5), %v2234_v11  ;;  %1940 = vmatpush3.bf16.msra.mxu1 (%p1213_p5), %v2234_v11 }
 0x4a2   : > { %v1529_v55 = vmul.f32 %v2227_v0, %v2225_v1   ;;  %1916 = vmatprep.subr.bf16.mxu0 (%p1213_p5), %v2235_v12  ;;  %1933 = vmatprep.subr.bf16.mxu1 (%p1213_p5), %v2235_v12 }
 0x4a4   : > { %1532 = vst [vmem:[%s1531_s12] sm:$0xff] %v1529_v55 }
 0x4a5   :  { %1917 = vmatpush3.bf16.msra.mxu0 %v2235_v12  ;;  %1941 = vmatpush3.bf16.msra.mxu1 %v2235_v12 }
 0x4ab   :  { %v1533_v7 = vld [vmem:[#allocation3] sm:$0xff]  ;;  %v1534_v46 = vld [vmem:[#allocation3 + $0x8] sm:$0xff]  ;;  %v1535_v13 = vld [vmem:[#allocation3 + $0x10] sm:$0xff] }
 0x4ac   :  { %v1537_v50 = vld [vmem:[#allocation3 + $0x20] sm:$0xff]  ;;  %v1541_v51 = vpack.c.bf16 %v1534_v46, %v1533_v7  ;;  %v1538_v8 = vld [vmem:[#allocation3 + $0x28] sm:$0xff]  ;;  %v1536_v14 = vld [vmem:[#allocation3 + $0x18] sm:$0xff] }
 0x4ad   :  { %v1543_v9 = vpack.c.bf16 %v1538_v8, %v1537_v50  ;;  %v1539_v15 = vld [vmem:[#allocation3 + $0x30] sm:$0xff]  ;;  %v1540_v16 = vld [vmem:[#allocation3 + $0x38] sm:$0xff]  ;;  %v1542_v17 = vpack.c.bf16 %v1536_v14, %v1535_v13 }
 0x4ae   :  { %1918 = vmatprep.mubr.bf16.mxu0 %v1541_v51  ;;  %v1544_v18 = vpack.c.bf16 %v1540_v16, %v1539_v15 }
 0x4af   :  { %1922 = vmatprep.mubr.bf16.mxu1 %v1543_v9  ;;  %1919 = vmatmul.mubr.bf16.vlgmr.msra.gmra.mrb[0].mxu0 %v1542_v17 }
 0x4b0   :  { %1923 = vmatmul.mubr.bf16.vlgmr.msra.gmra.mrb[0].mxu1 %v1544_v18 }
 0x582   :  { %v1920_v3 = vpop.f32.mrb[0].mxu0 }
 0x583   :  { %v1924_v20 = vpop.f32.mrb[0].mxu1  ;;  %v1659_v21 = vadd.f32 %v1920_v3, %v1879_v19  ;;  %v1650_v23 = vpop.f32.mrb[1].mxu0 }
 0x584   :  { %v1675_v22 = vadd.f32 %v1924_v20, %v1879_v19  ;;  %v1666_v24 = vpop.f32.mrb[1].mxu1  ;;  %v1651_v25 = vadd.f32 %v1879_v19, %v1650_v23  ;;  %v1921_v27 = vpop.f32.mrb[2].mxu0 }
 0x585   :  { %v1667_v26 = vadd.f32 %v1879_v19, %v1666_v24  ;;  %v1925_v28 = vpop.f32.mrb[2].mxu1  ;;  %1683 = vst [vmem:[#allocation12 + $0x10] sm:$0xff] %v1659_v21  ;;  %v1662_v29 = vadd.f32 %v1921_v27, %v1879_v19  ;;  %v1653_v31 = vpop.f32.mrb[3].mxu0 }
 0x586   :  { %1687 = vst [vmem:[#allocation12 + $0x30] sm:$0xff] %v1675_v22  ;;  %v1678_v30 = vadd.f32 %v1925_v28, %v1879_v19  ;;  %v1669_v32 = vpop.f32.mrb[3].mxu1  ;;  %1681 = vst [vmem:[#allocation12] sm:$0xff] %v1651_v25  ;;  %v1654_v33 = vadd.f32 %v1879_v19, %v1653_v31 }
 0x587   :  { %1685 = vst [vmem:[#allocation12 + $0x20] sm:$0xff] %v1667_v26  ;;  %v1670_v34 = vadd.f32 %v1879_v19, %v1669_v32  ;;  %1684 = vst [vmem:[#allocation12 + $0x18] sm:$0xff] %v1662_v29 }
 0x588   :  { %1688 = vst [vmem:[#allocation12 + $0x38] sm:$0xff] %v1678_v30  ;;  %1682 = vst [vmem:[#allocation12 + $0x8] sm:$0xff] %v1654_v33 }
 0x589   :  { %1686 = vst [vmem:[#allocation12 + $0x28] sm:$0xff] %v1670_v34 }
 0x58a   :  { %2335 = shalt.err (!%p2332_p10)
}
 0x58b   :  { %s2336_s20 = scalar_lea.hbm %s2717_s6, 1024 }
 0x58c   :  { %p2337_p11 = scmp.ne.s32.totalorder %s2717_s6, %s2336_s20  ;;  %p2340_p12 = scmp.lt.u32.totalorder %s2336_s20, %s2717_s6 }
 0x58e   :  { %p2342_p13 = pnand %p2340_p12, %p2337_p11 }
 0x590   :  { %2345 = shalt.err (!%p2342_p13)
}
 0x591   :  { %1700 = dma.vmem_to_hbm [thread:$0]  %s1695_s17, 1024, %s2717_s6, [#allocation6], %s2406_s1, %s2406_s1, %s2407_s21  }
 0x592   :  { %2376 = dma.done.wait [#allocation6], 1024  }
 0x593   :  { %2377 = vsyncadd [#allocation6], 4294966272 }
 0x594   :  { %1704 = vsyncpa [#allocation5], 1 }
 0x595   :  { %1705 = vsyncpa [#allocation8], 1 }
 0x596   :  { %1706 = vsyncpa [#allocation11], 1 }
 0x597   :  { %1707 = vsyncpa [#allocation6], 1 }

</bundles_post_ra>
